<compile_context>
chip_gen: v5e
topology: v5e:2x2
jax: 0.10.0
libtpu: 0.0.40
codegen_flags: <defaults>
</compile_context>

<pallas_src>
import math

import jax
import jax.numpy as jnp
from jax.experimental import pallas as pl

# ----------------------------- config (small) -------------------------------
BATCH = 2
SEQ = 8
HIDDEN = 32
NUM_HEADS = 4
HEAD_DIM = HIDDEN // NUM_HEADS
INTERMEDIATE = 64
NUM_LAYERS = 2
VOCAB = 128          # == TPU lane width -> one-hot embedding matmul is lane-dense
MAX_POS = 16
TS_IN = 2
TS_HIDDEN = 16
NUM_CLASSES = 2
LN_EPS = 1e-12
_GELU_C = math.sqrt(2.0 / math.pi)


# --------------------------- in-kernel helpers -------------------------------
def _layer_norm(x, g, b):
    mean = jnp.mean(x, axis=-1, keepdims=True)
    xc = x - mean
    var = jnp.mean(xc * xc, axis=-1, keepdims=True)
    inv = jax.lax.rsqrt(var + jnp.float32(LN_EPS))
    return xc * inv * g + b


def _gelu(y):
    # TODO(synk): HF BERT uses exact erf-GELU; tanh approximation used here for
    # robust Mosaic lowering (~1e-3 deviation from the PyTorch reference).
    return 0.5 * y * (1.0 + jnp.tanh(jnp.float32(_GELU_C) *
                                     (y + 0.044715 * y * y * y)))


# ----------------------------- fused kernel ----------------------------------
def _fused_forward_kernel(
    ids_ref, mask_ref, word_emb_ref, pos_emb_ref, type_emb_ref,
    emb_g_ref, emb_b_ref,
    wqkv_ref, bqkv_ref, wo_ref, bo_ref, ln1g_ref, ln1b_ref,
    w1_ref, b1_ref, w2_ref, b2_ref, ln2g_ref, ln2b_ref,
    pool_w_ref, pool_b_ref, ts_ref, ts_w1_ref, ts_b1_ref,
    ts_w2_ref, ts_b2_ref, cls_w_ref, cls_b_ref,
    logits_ref,
):
    f32 = jnp.float32

    # --- embeddings: one-hot gather on the MXU + pos/type add + LayerNorm ---
    ids = ids_ref[...]                                            # (B*S, 1) i32
    lane = jax.lax.broadcasted_iota(jnp.int32, (BATCH * SEQ, VOCAB), 1)
    onehot = jnp.where(ids == lane, 1.0, 0.0).astype(f32)          # (B*S, VOCAB)
    x = jnp.dot(onehot, word_emb_ref[...], preferred_element_type=f32)  # (B*S, H)
    pos = pos_emb_ref[0:SEQ, :] + type_emb_ref[0:1, :]             # (S, H)
    x = (x.reshape(BATCH, SEQ, HIDDEN) + pos[None, :, :]).reshape(
        BATCH * SEQ, HIDDEN)
    x = _layer_norm(x, emb_g_ref[...], emb_b_ref[...])

    # --- attention-mask bias: computed once, hoisted out of all loops ---
    mask = mask_ref[...].astype(f32)                               # (B, S)
    bias3 = ((1.0 - mask) * jnp.float32(-1e9))[:, None, :]         # (B, 1, S)

    scale = jnp.float32(1.0 / math.sqrt(HEAD_DIM))

    # --- encoder layers: statically unrolled, all weights VMEM-resident ---
    for l in range(NUM_LAYERS):
        wqkv, bqkv = wqkv_ref[l], bqkv_ref[l]                      # (H,3H),(1,3H)
        wo, bo = wo_ref[l], bo_ref[l]                              # (H,H),(1,H)

        # fused QKV projection: one MXU push, lane-dense 3H-wide output
        qkv = jnp.dot(x, wqkv, preferred_element_type=f32) + bqkv  # (B*S, 3H)
        q = qkv[:, 0 * HIDDEN:1 * HIDDEN].reshape(BATCH, SEQ, HIDDEN)
        k = qkv[:, 1 * HIDDEN:2 * HIDDEN].reshape(BATCH, SEQ, HIDDEN)
        v = qkv[:, 2 * HIDDEN:3 * HIDDEN].reshape(BATCH, SEQ, HIDDEN)

        # per-head attention; output projection accumulated per head (no concat)
        attn_out = None
        for h in range(NUM_HEADS):                                 # unrolled
            sl = slice(h * HEAD_DIM, (h + 1) * HEAD_DIM)
            qh, kh, vh = q[:, :, sl], k[:, :, sl], v[:, :, sl]     # (B, S, D)
            s = jnp.einsum("bqd,bkd->bqk", qh, kh,
                           preferred_element_type=f32) * scale + bias3
            m = jnp.max(s, axis=-1, keepdims=True)
            p = jnp.exp(s - m)
            # TODO(synk): approx reciprocal -> softmax rows sum to 1 only to
            # ~1e-3; acceptable for inference (EUP slot instead of VALU div).
            p = p * pl.reciprocal(jnp.sum(p, axis=-1, keepdims=True),
                                  approx=True)
            ctx = jnp.einsum("bqk,bkd->bqd", p, vh,
                             preferred_element_type=f32)           # (B, S, D)
            part = jnp.dot(ctx.reshape(BATCH * SEQ, HEAD_DIM),
                           wo[h * HEAD_DIM:(h + 1) * HEAD_DIM, :],
                           preferred_element_type=f32)             # (B*S, H)
            attn_out = part if attn_out is None else attn_out + part
        x = _layer_norm(x + attn_out + bo, ln1g_ref[l], ln1b_ref[l])

        # FFN + post-LN residual
        h1 = _gelu(jnp.dot(x, w1_ref[l], preferred_element_type=f32) + b1_ref[l])
        ffn = jnp.dot(h1, w2_ref[l], preferred_element_type=f32) + b2_ref[l]
        x = _layer_norm(x + ffn, ln2g_ref[l], ln2b_ref[l])

    # --- pooler + time-series MLP + classifier (no lane concat) ---
    cls_tok = x.reshape(BATCH, SEQ, HIDDEN)[:, 0, :]               # (B, H)
    pooled = jnp.tanh(
        jnp.dot(cls_tok, pool_w_ref[...], preferred_element_type=f32)
        + pool_b_ref[...])
    ts = ts_ref[...].astype(f32)
    t = jnp.maximum(
        jnp.dot(ts, ts_w1_ref[...], preferred_element_type=f32) + ts_b1_ref[...],
        0.0)
    t = jnp.dot(t, ts_w2_ref[...], preferred_element_type=f32) + ts_b2_ref[...]
    cls_w = cls_w_ref[...]                                         # (H+16, 2)
    logits = (jnp.dot(pooled, cls_w[0:HIDDEN, :], preferred_element_type=f32)
              + jnp.dot(t, cls_w[HIDDEN:HIDDEN + TS_HIDDEN, :],
                        preferred_element_type=f32)
              + cls_b_ref[...])
    logits_ref[...] = logits.astype(logits_ref.dtype)


# ------------------------------ pallas_call -----------------------------------
def _fused_forward(params, ids2d, attn_mask, time_series):
    # Grid-less single-step kernel: every input is a whole-array VMEM block
    # (total footprint well under 1 MiB on any TPU generation), so there is no
    # per-step pipelining overhead, no scratch carry, and no pl.when gating.
    return pl.pallas_call(
        _fused_forward_kernel,
        out_shape=jax.ShapeDtypeStruct((BATCH, NUM_CLASSES), jnp.float32),
    )(ids2d, attn_mask,
      params["word_emb"], params["pos_emb"], params["type_emb"],
      params["emb_ln_g"], params["emb_ln_b"],
      params["wqkv"], params["bqkv"], params["wo"], params["bo"],
      params["ln1_g"], params["ln1_b"], params["w1"], params["b1"],
      params["w2"], params["b2"], params["ln2_g"], params["ln2_b"],
      params["pool_w"], params["pool_b"], time_series,
      params["ts_w1"], params["ts_b1"], params["ts_w2"], params["ts_b2"],
      params["cls_w"], params["cls_b"])


# ----------------------------- parameters ------------------------------------
def init_params(key):
    keys = iter(jax.random.split(key, 32))

    def w(shape, scale=0.02):
        return jax.random.normal(next(keys), shape, jnp.float32) * scale

    return {
        "word_emb": w((VOCAB, HIDDEN)),
        "pos_emb": w((MAX_POS, HIDDEN)),
        "type_emb": w((2, HIDDEN)),
        "emb_ln_g": jnp.ones((1, HIDDEN), jnp.float32),
        "emb_ln_b": jnp.zeros((1, HIDDEN), jnp.float32),
        # per-layer weights stacked on a leading layer axis; QKV fused to 3H.
        "wqkv": w((NUM_LAYERS, HIDDEN, 3 * HIDDEN)),
        "bqkv": jnp.zeros((NUM_LAYERS, 1, 3 * HIDDEN), jnp.float32),
        "wo": w((NUM_LAYERS, HIDDEN, HIDDEN)),
        "bo": jnp.zeros((NUM_LAYERS, 1, HIDDEN), jnp.float32),
        "ln1_g": jnp.ones((NUM_LAYERS, 1, HIDDEN), jnp.float32),
        "ln1_b": jnp.zeros((NUM_LAYERS, 1, HIDDEN), jnp.float32),
        "w1": w((NUM_LAYERS, HIDDEN, INTERMEDIATE)),
        "b1": jnp.zeros((NUM_LAYERS, 1, INTERMEDIATE), jnp.float32),
        "w2": w((NUM_LAYERS, INTERMEDIATE, HIDDEN)),
        "b2": jnp.zeros((NUM_LAYERS, 1, HIDDEN), jnp.float32),
        "ln2_g": jnp.ones((NUM_LAYERS, 1, HIDDEN), jnp.float32),
        "ln2_b": jnp.zeros((NUM_LAYERS, 1, HIDDEN), jnp.float32),
        "pool_w": w((HIDDEN, HIDDEN)),
        "pool_b": jnp.zeros((1, HIDDEN), jnp.float32),
        # time_series_encoder: Linear(2,16) -> ReLU -> Linear(16,16)
        "ts_w1": w((TS_IN, TS_HIDDEN), 0.1),
        "ts_b1": jnp.zeros((1, TS_HIDDEN), jnp.float32),
        "ts_w2": w((TS_HIDDEN, TS_HIDDEN), 0.1),
        "ts_b2": jnp.zeros((1, TS_HIDDEN), jnp.float32),
        # classifier: Linear(hidden + 16, 2)
        "cls_w": w((HIDDEN + TS_HIDDEN, NUM_CLASSES), 0.1),
        "cls_b": jnp.zeros((1, NUM_CLASSES), jnp.float32),
        # TODO(synk): class-weight ratio len(positive)/len(negative) comes from
        # the NSMC dataset which is unavailable here; fixed to 1.5.
        "ce_weights": jnp.array([1.0, 1.5], jnp.float32),
    }


# ----------------------------- forward pass -----------------------------------
def bert_with_time_series_forward(params, input_ids, attention_mask,
                                  time_series, labels=None):
    B, S = input_ids.shape
    assert (B, S) == (BATCH, SEQ)

    ids2d = input_ids.reshape(B * S, 1).astype(jnp.int32)
    logits = _fused_forward(params, ids2d, attention_mask.astype(jnp.int32),
                            time_series.astype(jnp.float32))       # (B, 2)

    if labels is not None:
        # weighted CrossEntropyLoss (mean reduction, PyTorch semantics) - glue
        logp = jax.nn.log_softmax(logits, axis=-1)
        w = params["ce_weights"][labels]
        nll = -jnp.take_along_axis(logp, labels[:, None], axis=1)[:, 0]
        loss = jnp.sum(w * nll) / jnp.sum(w)
        return {"loss": loss, "logits": logits}
    return {"logits": logits}


# ----------------------------- main --------------------------------------------
if __name__ == "__main__":
    root = jax.random.PRNGKey(0)
    kp, ki, kt = jax.random.split(root, 3)

    params = init_params(kp)

    input_ids = jax.random.randint(ki, (BATCH, SEQ), 0, VOCAB, dtype=jnp.int32)
    attention_mask = jnp.ones((BATCH, SEQ), jnp.int32).at[1, 6:].set(0)
    time_series = jax.random.normal(kt, (BATCH, TS_IN), jnp.float32)
    labels = jnp.array([0, 1], jnp.int32)

    fwd = jax.jit(bert_with_time_series_forward)
    out = fwd(params, input_ids, attention_mask, time_series, labels=labels)
    jax.block_until_ready(out["logits"])
    jax.block_until_ready(out["loss"])
    assert out["logits"].shape == (BATCH, NUM_CLASSES)
    assert bool(jnp.all(jnp.isfinite(out["logits"])))
    assert bool(jnp.isfinite(out["loss"]))
    print("KERNEL_OK")
</pallas_src>

<mosaic_0001>
module attributes {stable_mosaic.version = 11 : i64} {
  func.func @_fused_forward_kernel(%arg0: memref<16x1xi32, #tpu.memory_space<vmem>>, %arg1: memref<2x8xi32, #tpu.memory_space<vmem>>, %arg2: memref<128x32xf32, #tpu.memory_space<vmem>>, %arg3: memref<16x32xf32, #tpu.memory_space<vmem>>, %arg4: memref<2x32xf32, #tpu.memory_space<vmem>>, %arg5: memref<1x32xf32, #tpu.memory_space<vmem>>, %arg6: memref<1x32xf32, #tpu.memory_space<vmem>>, %arg7: memref<2x32x96xf32, #tpu.memory_space<vmem>>, %arg8: memref<2x1x96xf32, #tpu.memory_space<vmem>>, %arg9: memref<2x32x32xf32, #tpu.memory_space<vmem>>, %arg10: memref<2x1x32xf32, #tpu.memory_space<vmem>>, %arg11: memref<2x1x32xf32, #tpu.memory_space<vmem>>, %arg12: memref<2x1x32xf32, #tpu.memory_space<vmem>>, %arg13: memref<2x32x64xf32, #tpu.memory_space<vmem>>, %arg14: memref<2x1x64xf32, #tpu.memory_space<vmem>>, %arg15: memref<2x64x32xf32, #tpu.memory_space<vmem>>, %arg16: memref<2x1x32xf32, #tpu.memory_space<vmem>>, %arg17: memref<2x1x32xf32, #tpu.memory_space<vmem>>, %arg18: memref<2x1x32xf32, #tpu.memory_space<vmem>>, %arg19: memref<32x32xf32, #tpu.memory_space<vmem>>, %arg20: memref<1x32xf32, #tpu.memory_space<vmem>>, %arg21: memref<2x2xf32, #tpu.memory_space<vmem>>, %arg22: memref<2x16xf32, #tpu.memory_space<vmem>>, %arg23: memref<1x16xf32, #tpu.memory_space<vmem>>, %arg24: memref<16x16xf32, #tpu.memory_space<vmem>>, %arg25: memref<1x16xf32, #tpu.memory_space<vmem>>, %arg26: memref<48x2xf32, #tpu.memory_space<vmem>>, %arg27: memref<1x2xf32, #tpu.memory_space<vmem>>, %arg28: memref<2x2xf32, #tpu.memory_space<vmem>>) attributes {dimension_semantics = [], scalar_prefetch = 0 : i64, scratch_operands = 0 : i64, tpu.core_type = #tpu.core_type<tc>} {
    %c0 = arith.constant 0 : index
    %c0_0 = arith.constant 0 : index
    %0 = vector.load %arg0[%c0, %c0_0] : memref<16x1xi32, #tpu.memory_space<vmem>>, vector<16x1xi32>
    %1 = tpu.iota {dimensions = array<i32: 1>} : vector<16x128xi32>
    %2 = vector.broadcast %0 : vector<16x1xi32> to vector<16x128xi32>
    %3 = arith.cmpi eq, %2, %1 : vector<16x128xi32>
    %cst = arith.constant 1.000000e+00 : f32
    %cst_1 = arith.constant 0.000000e+00 : f32
    %4 = vector.broadcast %cst : f32 to vector<16x128xf32>
    %5 = vector.broadcast %cst_1 : f32 to vector<16x128xf32>
    %6 = arith.select %3, %4, %5 : vector<16x128xi1>, vector<16x128xf32>
    %c0_2 = arith.constant 0 : index
    %c0_3 = arith.constant 0 : index
    %7 = vector.load %arg2[%c0_2, %c0_3] : memref<128x32xf32, #tpu.memory_space<vmem>>, vector<128x32xf32>
    %cst_4 = arith.constant dense<0.000000e+00> : vector<16x32xf32>
    %8 = tpu.matmul %6, %7, %cst_4 {dimension_numbers = #tpu.dot_dimension_numbers<[1], [0], [0], [1], [0, 0, 1, 1], [], []>} : vector<16x128xf32>, vector<128x32xf32>, vector<16x32xf32> -> vector<16x32xf32>
    %c0_5 = arith.constant 0 : index
    %c0_6 = arith.constant 0 : index
    %9 = vector.load %arg3[%c0_5, %c0_6] : memref<16x32xf32, #tpu.memory_space<vmem>>, vector<8x32xf32>
    %c0_7 = arith.constant 0 : index
    %c0_8 = arith.constant 0 : index
    %10 = vector.load %arg4[%c0_7, %c0_8] : memref<2x32xf32, #tpu.memory_space<vmem>>, vector<1x32xf32>
    %11 = vector.broadcast %10 : vector<1x32xf32> to vector<8x32xf32>
    %12 = arith.addf %9, %11 : vector<8x32xf32>
    %13 = vector.shape_cast %8 : vector<16x32xf32> to vector<2x8x32xf32>
    %14 = vector.shape_cast %12 : vector<8x32xf32> to vector<1x8x32xf32>
    %15 = vector.broadcast %14 : vector<1x8x32xf32> to vector<2x8x32xf32>
    %16 = arith.addf %13, %15 : vector<2x8x32xf32>
    %17 = vector.shape_cast %16 : vector<2x8x32xf32> to vector<16x32xf32>
    %c0_9 = arith.constant 0 : index
    %c0_10 = arith.constant 0 : index
    %18 = vector.load %arg5[%c0_9, %c0_10] : memref<1x32xf32, #tpu.memory_space<vmem>>, vector<1x32xf32>
    %c0_11 = arith.constant 0 : index
    %c0_12 = arith.constant 0 : index
    %19 = vector.load %arg6[%c0_11, %c0_12] : memref<1x32xf32, #tpu.memory_space<vmem>>, vector<1x32xf32>
    %cst_13 = arith.constant dense<0.000000e+00> : vector<16xf32>
    %20 = vector.multi_reduction <add>, %17, %cst_13 [1] : vector<16x32xf32> to vector<16xf32>
    %21 = vector.shape_cast %20 : vector<16xf32> to vector<16x1xf32>
    %cst_14 = arith.constant 3.200000e+01 : f32
    %22 = vector.broadcast %cst_14 : f32 to vector<16x1xf32>
    %23 = arith.divf %21, %22 : vector<16x1xf32>
    %24 = vector.broadcast %23 : vector<16x1xf32> to vector<16x32xf32>
    %25 = arith.subf %17, %24 : vector<16x32xf32>
    %26 = arith.mulf %25, %25 : vector<16x32xf32>
    %cst_15 = arith.constant dense<0.000000e+00> : vector<16xf32>
    %27 = vector.multi_reduction <add>, %26, %cst_15 [1] : vector<16x32xf32> to vector<16xf32>
    %28 = vector.shape_cast %27 : vector<16xf32> to vector<16x1xf32>
    %cst_16 = arith.constant 3.200000e+01 : f32
    %29 = vector.broadcast %cst_16 : f32 to vector<16x1xf32>
    %30 = arith.divf %28, %29 : vector<16x1xf32>
    %cst_17 = arith.constant 9.99999996E-13 : f32
    %31 = vector.broadcast %cst_17 : f32 to vector<16x1xf32>
    %32 = arith.addf %30, %31 : vector<16x1xf32>
    %33 = math.rsqrt %32 : vector<16x1xf32>
    %34 = vector.broadcast %33 : vector<16x1xf32> to vector<16x32xf32>
    %35 = arith.mulf %25, %34 : vector<16x32xf32>
    %36 = vector.broadcast %18 : vector<1x32xf32> to vector<16x32xf32>
    %37 = arith.mulf %35, %36 : vector<16x32xf32>
    %38 = vector.broadcast %19 : vector<1x32xf32> to vector<16x32xf32>
    %39 = arith.addf %37, %38 : vector<16x32xf32>
    %c0_18 = arith.constant 0 : index
    %c0_19 = arith.constant 0 : index
    %40 = vector.load %arg1[%c0_18, %c0_19] : memref<2x8xi32, #tpu.memory_space<vmem>>, vector<2x8xi32>
    %41 = arith.sitofp %40 : vector<2x8xi32> to vector<2x8xf32>
    %cst_20 = arith.constant 1.000000e+00 : f32
    %42 = vector.broadcast %cst_20 : f32 to vector<2x8xf32>
    %43 = arith.subf %42, %41 : vector<2x8xf32>
    %cst_21 = arith.constant -1.000000e+09 : f32
    %44 = vector.broadcast %cst_21 : f32 to vector<2x8xf32>
    %45 = arith.mulf %43, %44 : vector<2x8xf32>
    %46 = vector.shape_cast %45 : vector<2x8xf32> to vector<2x1x8xf32>
    %c0_22 = arith.constant 0 : index
    %c0_23 = arith.constant 0 : index
    %c0_24 = arith.constant 0 : index
    %47 = vector.load %arg7[%c0_22, %c0_23, %c0_24] : memref<2x32x96xf32, #tpu.memory_space<vmem>>, vector<1x32x96xf32>
    %48 = vector.shape_cast %47 : vector<1x32x96xf32> to vector<32x96xf32>
    %c0_25 = arith.constant 0 : index
    %c0_26 = arith.constant 0 : index
    %c0_27 = arith.constant 0 : index
    %49 = vector.load %arg8[%c0_25, %c0_26, %c0_27] : memref<2x1x96xf32, #tpu.memory_space<vmem>>, vector<1x1x96xf32>
    %50 = vector.shape_cast %49 : vector<1x1x96xf32> to vector<1x96xf32>
    %c0_28 = arith.constant 0 : index
    %c0_29 = arith.constant 0 : index
    %c0_30 = arith.constant 0 : index
    %51 = vector.load %arg9[%c0_28, %c0_29, %c0_30] : memref<2x32x32xf32, #tpu.memory_space<vmem>>, vector<1x32x32xf32>
    %52 = vector.shape_cast %51 : vector<1x32x32xf32> to vector<32x32xf32>
    %c0_31 = arith.constant 0 : index
    %c0_32 = arith.constant 0 : index
    %c0_33 = arith.constant 0 : index
    %53 = vector.load %arg10[%c0_31, %c0_32, %c0_33] : memref<2x1x32xf32, #tpu.memory_space<vmem>>, vector<1x1x32xf32>
    %54 = vector.shape_cast %53 : vector<1x1x32xf32> to vector<1x32xf32>
    %cst_34 = arith.constant dense<0.000000e+00> : vector<16x96xf32>
    %55 = tpu.matmul %39, %48, %cst_34 {dimension_numbers = #tpu.dot_dimension_numbers<[1], [0], [0], [1], [0, 0, 1, 1], [], []>} : vector<16x32xf32>, vector<32x96xf32>, vector<16x96xf32> -> vector<16x96xf32>
    %56 = vector.broadcast %50 : vector<1x96xf32> to vector<16x96xf32>
    %57 = arith.addf %55, %56 : vector<16x96xf32>
    %58 = vector.extract_strided_slice %57 {offsets = [0, 0], sizes = [16, 32], strides = [1, 1]} : vector<16x96xf32> to vector<16x32xf32>
    %59 = vector.shape_cast %58 : vector<16x32xf32> to vector<2x8x32xf32>
    %60 = vector.extract_strided_slice %57 {offsets = [0, 32], sizes = [16, 32], strides = [1, 1]} : vector<16x96xf32> to vector<16x32xf32>
    %61 = vector.shape_cast %60 : vector<16x32xf32> to vector<2x8x32xf32>
    %62 = vector.extract_strided_slice %57 {offsets = [0, 64], sizes = [16, 32], strides = [1, 1]} : vector<16x96xf32> to vector<16x32xf32>
    %63 = vector.shape_cast %62 : vector<16x32xf32> to vector<2x8x32xf32>
    %64 = vector.extract_strided_slice %59 {offsets = [0, 0, 0], sizes = [2, 8, 8], strides = [1, 1, 1]} : vector<2x8x32xf32> to vector<2x8x8xf32>
    %65 = vector.extract_strided_slice %61 {offsets = [0, 0, 0], sizes = [2, 8, 8], strides = [1, 1, 1]} : vector<2x8x32xf32> to vector<2x8x8xf32>
    %66 = vector.extract_strided_slice %63 {offsets = [0, 0, 0], sizes = [2, 8, 8], strides = [1, 1, 1]} : vector<2x8x32xf32> to vector<2x8x8xf32>
    "tpu.trace_start"() <{level = 10 : i32, message = "bqd,bkd->bqk"}> : () -> ()
    %cst_35 = arith.constant dense<0.000000e+00> : vector<2x8x8xf32>
    %67 = tpu.matmul %64, %65, %cst_35 {dimension_numbers = #tpu.dot_dimension_numbers<[2], [2], [1], [1], [0, 0, 0, 1, 1, 1], [0], [0]>} : vector<2x8x8xf32>, vector<2x8x8xf32>, vector<2x8x8xf32> -> vector<2x8x8xf32>
    "tpu.trace_stop"() : () -> ()
    %cst_36 = arith.constant 0.353553385 : f32
    %68 = vector.broadcast %cst_36 : f32 to vector<2x8x8xf32>
    %69 = arith.mulf %67, %68 : vector<2x8x8xf32>
    %70 = vector.broadcast %46 : vector<2x1x8xf32> to vector<2x8x8xf32>
    %71 = arith.addf %69, %70 : vector<2x8x8xf32>
    %cst_37 = arith.constant dense<0xFF800000> : vector<2x8xf32>
    %72 = vector.multi_reduction <maximumf>, %71, %cst_37 [2] : vector<2x8x8xf32> to vector<2x8xf32>
    %73 = vector.shape_cast %72 : vector<2x8xf32> to vector<2x8x1xf32>
    %74 = vector.broadcast %73 : vector<2x8x1xf32> to vector<2x8x8xf32>
    %75 = arith.subf %71, %74 : vector<2x8x8xf32>
    %76 = math.exp %75 : vector<2x8x8xf32>
    %cst_38 = arith.constant dense<0.000000e+00> : vector<2x8xf32>
    %77 = vector.multi_reduction <add>, %76, %cst_38 [2] : vector<2x8x8xf32> to vector<2x8xf32>
    %78 = vector.shape_cast %77 : vector<2x8xf32> to vector<2x8x1xf32>
    %79 = tpu.reciprocal %78 {approx = true} : vector<2x8x1xf32> -> vector<2x8x1xf32>
    %80 = vector.broadcast %79 : vector<2x8x1xf32> to vector<2x8x8xf32>
    %81 = arith.mulf %76, %80 : vector<2x8x8xf32>
    "tpu.trace_start"() <{level = 10 : i32, message = "bqk,bkd->bqd"}> : () -> ()
    %cst_39 = arith.constant dense<0.000000e+00> : vector<2x8x8xf32>
    %82 = tpu.matmul %81, %66, %cst_39 {dimension_numbers = #tpu.dot_dimension_numbers<[2], [1], [1], [2], [0, 0, 0, 1, 1, 2], [0], [0]>} : vector<2x8x8xf32>, vector<2x8x8xf32>, vector<2x8x8xf32> -> vector<2x8x8xf32>
    "tpu.trace_stop"() : () -> ()
    %83 = vector.shape_cast %82 : vector<2x8x8xf32> to vector<16x8xf32>
    %84 = vector.extract_strided_slice %52 {offsets = [0, 0], sizes = [8, 32], strides = [1, 1]} : vector<32x32xf32> to vector<8x32xf32>
    %cst_40 = arith.constant dense<0.000000e+00> : vector<16x32xf32>
    %85 = tpu.matmul %83, %84, %cst_40 {dimension_numbers = #tpu.dot_dimension_numbers<[1], [0], [0], [1], [0, 0, 1, 1], [], []>} : vector<16x8xf32>, vector<8x32xf32>, vector<16x32xf32> -> vector<16x32xf32>
    %86 = vector.extract_strided_slice %59 {offsets = [0, 0, 8], sizes = [2, 8, 8], strides = [1, 1, 1]} : vector<2x8x32xf32> to vector<2x8x8xf32>
    %87 = vector.extract_strided_slice %61 {offsets = [0, 0, 8], sizes = [2, 8, 8], strides = [1, 1, 1]} : vector<2x8x32xf32> to vector<2x8x8xf32>
    %88 = vector.extract_strided_slice %63 {offsets = [0, 0, 8], sizes = [2, 8, 8], strides = [1, 1, 1]} : vector<2x8x32xf32> to vector<2x8x8xf32>
    "tpu.trace_start"() <{level = 10 : i32, message = "bqd,bkd->bqk"}> : () -> ()
    %cst_41 = arith.constant dense<0.000000e+00> : vector<2x8x8xf32>
    %89 = tpu.matmul %86, %87, %cst_41 {dimension_numbers = #tpu.dot_dimension_numbers<[2], [2], [1], [1], [0, 0, 0, 1, 1, 1], [0], [0]>} : vector<2x8x8xf32>, vector<2x8x8xf32>, vector<2x8x8xf32> -> vector<2x8x8xf32>
    "tpu.trace_stop"() : () -> ()
    %cst_42 = arith.constant 0.353553385 : f32
    %90 = vector.broadcast %cst_42 : f32 to vector<2x8x8xf32>
    %91 = arith.mulf %89, %90 : vector<2x8x8xf32>
    %92 = vector.broadcast %46 : vector<2x1x8xf32> to vector<2x8x8xf32>
    %93 = arith.addf %91, %92 : vector<2x8x8xf32>
    %cst_43 = arith.constant dense<0xFF800000> : vector<2x8xf32>
    %94 = vector.multi_reduction <maximumf>, %93, %cst_43 [2] : vector<2x8x8xf32> to vector<2x8xf32>
    %95 = vector.shape_cast %94 : vector<2x8xf32> to vector<2x8x1xf32>
    %96 = vector.broadcast %95 : vector<2x8x1xf32> to vector<2x8x8xf32>
    %97 = arith.subf %93, %96 : vector<2x8x8xf32>
    %98 = math.exp %97 : vector<2x8x8xf32>
    %cst_44 = arith.constant dense<0.000000e+00> : vector<2x8xf32>
    %99 = vector.multi_reduction <add>, %98, %cst_44 [2] : vector<2x8x8xf32> to vector<2x8xf32>
    %100 = vector.shape_cast %99 : vector<2x8xf32> to vector<2x8x1xf32>
    %101 = tpu.reciprocal %100 {approx = true} : vector<2x8x1xf32> -> vector<2x8x1xf32>
    %102 = vector.broadcast %101 : vector<2x8x1xf32> to vector<2x8x8xf32>
    %103 = arith.mulf %98, %102 : vector<2x8x8xf32>
    "tpu.trace_start"() <{level = 10 : i32, message = "bqk,bkd->bqd"}> : () -> ()
    %cst_45 = arith.constant dense<0.000000e+00> : vector<2x8x8xf32>
    %104 = tpu.matmul %103, %88, %cst_45 {dimension_numbers = #tpu.dot_dimension_numbers<[2], [1], [1], [2], [0, 0, 0, 1, 1, 2], [0], [0]>} : vector<2x8x8xf32>, vector<2x8x8xf32>, vector<2x8x8xf32> -> vector<2x8x8xf32>
    "tpu.trace_stop"() : () -> ()
    %105 = vector.shape_cast %104 : vector<2x8x8xf32> to vector<16x8xf32>
    %106 = vector.extract_strided_slice %52 {offsets = [8, 0], sizes = [8, 32], strides = [1, 1]} : vector<32x32xf32> to vector<8x32xf32>
    %cst_46 = arith.constant dense<0.000000e+00> : vector<16x32xf32>
    %107 = tpu.matmul %105, %106, %cst_46 {dimension_numbers = #tpu.dot_dimension_numbers<[1], [0], [0], [1], [0, 0, 1, 1], [], []>} : vector<16x8xf32>, vector<8x32xf32>, vector<16x32xf32> -> vector<16x32xf32>
    %108 = arith.addf %85, %107 : vector<16x32xf32>
    %109 = vector.extract_strided_slice %59 {offsets = [0, 0, 16], sizes = [2, 8, 8], strides = [1, 1, 1]} : vector<2x8x32xf32> to vector<2x8x8xf32>
    %110 = vector.extract_strided_slice %61 {offsets = [0, 0, 16], sizes = [2, 8, 8], strides = [1, 1, 1]} : vector<2x8x32xf32> to vector<2x8x8xf32>
    %111 = vector.extract_strided_slice %63 {offsets = [0, 0, 16], sizes = [2, 8, 8], strides = [1, 1, 1]} : vector<2x8x32xf32> to vector<2x8x8xf32>
    "tpu.trace_start"() <{level = 10 : i32, message = "bqd,bkd->bqk"}> : () -> ()
    %cst_47 = arith.constant dense<0.000000e+00> : vector<2x8x8xf32>
    %112 = tpu.matmul %109, %110, %cst_47 {dimension_numbers = #tpu.dot_dimension_numbers<[2], [2], [1], [1], [0, 0, 0, 1, 1, 1], [0], [0]>} : vector<2x8x8xf32>, vector<2x8x8xf32>, vector<2x8x8xf32> -> vector<2x8x8xf32>
    "tpu.trace_stop"() : () -> ()
    %cst_48 = arith.constant 0.353553385 : f32
    %113 = vector.broadcast %cst_48 : f32 to vector<2x8x8xf32>
    %114 = arith.mulf %112, %113 : vector<2x8x8xf32>
    %115 = vector.broadcast %46 : vector<2x1x8xf32> to vector<2x8x8xf32>
    %116 = arith.addf %114, %115 : vector<2x8x8xf32>
    %cst_49 = arith.constant dense<0xFF800000> : vector<2x8xf32>
    %117 = vector.multi_reduction <maximumf>, %116, %cst_49 [2] : vector<2x8x8xf32> to vector<2x8xf32>
    %118 = vector.shape_cast %117 : vector<2x8xf32> to vector<2x8x1xf32>
    %119 = vector.broadcast %118 : vector<2x8x1xf32> to vector<2x8x8xf32>
    %120 = arith.subf %116, %119 : vector<2x8x8xf32>
    %121 = math.exp %120 : vector<2x8x8xf32>
    %cst_50 = arith.constant dense<0.000000e+00> : vector<2x8xf32>
    %122 = vector.multi_reduction <add>, %121, %cst_50 [2] : vector<2x8x8xf32> to vector<2x8xf32>
    %123 = vector.shape_cast %122 : vector<2x8xf32> to vector<2x8x1xf32>
    %124 = tpu.reciprocal %123 {approx = true} : vector<2x8x1xf32> -> vector<2x8x1xf32>
    %125 = vector.broadcast %124 : vector<2x8x1xf32> to vector<2x8x8xf32>
    %126 = arith.mulf %121, %125 : vector<2x8x8xf32>
    "tpu.trace_start"() <{level = 10 : i32, message = "bqk,bkd->bqd"}> : () -> ()
    %cst_51 = arith.constant dense<0.000000e+00> : vector<2x8x8xf32>
    %127 = tpu.matmul %126, %111, %cst_51 {dimension_numbers = #tpu.dot_dimension_numbers<[2], [1], [1], [2], [0, 0, 0, 1, 1, 2], [0], [0]>} : vector<2x8x8xf32>, vector<2x8x8xf32>, vector<2x8x8xf32> -> vector<2x8x8xf32>
    "tpu.trace_stop"() : () -> ()
    %128 = vector.shape_cast %127 : vector<2x8x8xf32> to vector<16x8xf32>
    %129 = vector.extract_strided_slice %52 {offsets = [16, 0], sizes = [8, 32], strides = [1, 1]} : vector<32x32xf32> to vector<8x32xf32>
    %cst_52 = arith.constant dense<0.000000e+00> : vector<16x32xf32>
    %130 = tpu.matmul %128, %129, %cst_52 {dimension_numbers = #tpu.dot_dimension_numbers<[1], [0], [0], [1], [0, 0, 1, 1], [], []>} : vector<16x8xf32>, vector<8x32xf32>, vector<16x32xf32> -> vector<16x32xf32>
    %131 = arith.addf %108, %130 : vector<16x32xf32>
    %132 = vector.extract_strided_slice %59 {offsets = [0, 0, 24], sizes = [2, 8, 8], strides = [1, 1, 1]} : vector<2x8x32xf32> to vector<2x8x8xf32>
    %133 = vector.extract_strided_slice %61 {offsets = [0, 0, 24], sizes = [2, 8, 8], strides = [1, 1, 1]} : vector<2x8x32xf32> to vector<2x8x8xf32>
    %134 = vector.extract_strided_slice %63 {offsets = [0, 0, 24], sizes = [2, 8, 8], strides = [1, 1, 1]} : vector<2x8x32xf32> to vector<2x8x8xf32>
    "tpu.trace_start"() <{level = 10 : i32, message = "bqd,bkd->bqk"}> : () -> ()
    %cst_53 = arith.constant dense<0.000000e+00> : vector<2x8x8xf32>
    %135 = tpu.matmul %132, %133, %cst_53 {dimension_numbers = #tpu.dot_dimension_numbers<[2], [2], [1], [1], [0, 0, 0, 1, 1, 1], [0], [0]>} : vector<2x8x8xf32>, vector<2x8x8xf32>, vector<2x8x8xf32> -> vector<2x8x8xf32>
    "tpu.trace_stop"() : () -> ()
    %cst_54 = arith.constant 0.353553385 : f32
    %136 = vector.broadcast %cst_54 : f32 to vector<2x8x8xf32>
    %137 = arith.mulf %135, %136 : vector<2x8x8xf32>
    %138 = vector.broadcast %46 : vector<2x1x8xf32> to vector<2x8x8xf32>
    %139 = arith.addf %137, %138 : vector<2x8x8xf32>
    %cst_55 = arith.constant dense<0xFF800000> : vector<2x8xf32>
    %140 = vector.multi_reduction <maximumf>, %139, %cst_55 [2] : vector<2x8x8xf32> to vector<2x8xf32>
    %141 = vector.shape_cast %140 : vector<2x8xf32> to vector<2x8x1xf32>
    %142 = vector.broadcast %141 : vector<2x8x1xf32> to vector<2x8x8xf32>
    %143 = arith.subf %139, %142 : vector<2x8x8xf32>
    %144 = math.exp %143 : vector<2x8x8xf32>
    %cst_56 = arith.constant dense<0.000000e+00> : vector<2x8xf32>
    %145 = vector.multi_reduction <add>, %144, %cst_56 [2] : vector<2x8x8xf32> to vector<2x8xf32>
    %146 = vector.shape_cast %145 : vector<2x8xf32> to vector<2x8x1xf32>
    %147 = tpu.reciprocal %146 {approx = true} : vector<2x8x1xf32> -> vector<2x8x1xf32>
    %148 = vector.broadcast %147 : vector<2x8x1xf32> to vector<2x8x8xf32>
    %149 = arith.mulf %144, %148 : vector<2x8x8xf32>
    "tpu.trace_start"() <{level = 10 : i32, message = "bqk,bkd->bqd"}> : () -> ()
    %cst_57 = arith.constant dense<0.000000e+00> : vector<2x8x8xf32>
    %150 = tpu.matmul %149, %134, %cst_57 {dimension_numbers = #tpu.dot_dimension_numbers<[2], [1], [1], [2], [0, 0, 0, 1, 1, 2], [0], [0]>} : vector<2x8x8xf32>, vector<2x8x8xf32>, vector<2x8x8xf32> -> vector<2x8x8xf32>
    "tpu.trace_stop"() : () -> ()
    %151 = vector.shape_cast %150 : vector<2x8x8xf32> to vector<16x8xf32>
    %152 = vector.extract_strided_slice %52 {offsets = [24, 0], sizes = [8, 32], strides = [1, 1]} : vector<32x32xf32> to vector<8x32xf32>
    %cst_58 = arith.constant dense<0.000000e+00> : vector<16x32xf32>
    %153 = tpu.matmul %151, %152, %cst_58 {dimension_numbers = #tpu.dot_dimension_numbers<[1], [0], [0], [1], [0, 0, 1, 1], [], []>} : vector<16x8xf32>, vector<8x32xf32>, vector<16x32xf32> -> vector<16x32xf32>
    %154 = arith.addf %131, %153 : vector<16x32xf32>
    %155 = arith.addf %39, %154 : vector<16x32xf32>
    %156 = vector.broadcast %54 : vector<1x32xf32> to vector<16x32xf32>
    %157 = arith.addf %155, %156 : vector<16x32xf32>
    %c0_59 = arith.constant 0 : index
    %c0_60 = arith.constant 0 : index
    %c0_61 = arith.constant 0 : index
    %158 = vector.load %arg11[%c0_59, %c0_60, %c0_61] : memref<2x1x32xf32, #tpu.memory_space<vmem>>, vector<1x1x32xf32>
    %159 = vector.shape_cast %158 : vector<1x1x32xf32> to vector<1x32xf32>
    %c0_62 = arith.constant 0 : index
    %c0_63 = arith.constant 0 : index
    %c0_64 = arith.constant 0 : index
    %160 = vector.load %arg12[%c0_62, %c0_63, %c0_64] : memref<2x1x32xf32, #tpu.memory_space<vmem>>, vector<1x1x32xf32>
    %161 = vector.shape_cast %160 : vector<1x1x32xf32> to vector<1x32xf32>
    %cst_65 = arith.constant dense<0.000000e+00> : vector<16xf32>
    %162 = vector.multi_reduction <add>, %157, %cst_65 [1] : vector<16x32xf32> to vector<16xf32>
    %163 = vector.shape_cast %162 : vector<16xf32> to vector<16x1xf32>
    %cst_66 = arith.constant 3.200000e+01 : f32
    %164 = vector.broadcast %cst_66 : f32 to vector<16x1xf32>
    %165 = arith.divf %163, %164 : vector<16x1xf32>
    %166 = vector.broadcast %165 : vector<16x1xf32> to vector<16x32xf32>
    %167 = arith.subf %157, %166 : vector<16x32xf32>
    %168 = arith.mulf %167, %167 : vector<16x32xf32>
    %cst_67 = arith.constant dense<0.000000e+00> : vector<16xf32>
    %169 = vector.multi_reduction <add>, %168, %cst_67 [1] : vector<16x32xf32> to vector<16xf32>
    %170 = vector.shape_cast %169 : vector<16xf32> to vector<16x1xf32>
    %cst_68 = arith.constant 3.200000e+01 : f32
    %171 = vector.broadcast %cst_68 : f32 to vector<16x1xf32>
    %172 = arith.divf %170, %171 : vector<16x1xf32>
    %cst_69 = arith.constant 9.99999996E-13 : f32
    %173 = vector.broadcast %cst_69 : f32 to vector<16x1xf32>
    %174 = arith.addf %172, %173 : vector<16x1xf32>
    %175 = math.rsqrt %174 : vector<16x1xf32>
    %176 = vector.broadcast %175 : vector<16x1xf32> to vector<16x32xf32>
    %177 = arith.mulf %167, %176 : vector<16x32xf32>
    %178 = vector.broadcast %159 : vector<1x32xf32> to vector<16x32xf32>
    %179 = arith.mulf %177, %178 : vector<16x32xf32>
    %180 = vector.broadcast %161 : vector<1x32xf32> to vector<16x32xf32>
    %181 = arith.addf %179, %180 : vector<16x32xf32>
    %c0_70 = arith.constant 0 : index
    %c0_71 = arith.constant 0 : index
    %c0_72 = arith.constant 0 : index
    %182 = vector.load %arg13[%c0_70, %c0_71, %c0_72] : memref<2x32x64xf32, #tpu.memory_space<vmem>>, vector<1x32x64xf32>
    %183 = vector.shape_cast %182 : vector<1x32x64xf32> to vector<32x64xf32>
    %cst_73 = arith.constant dense<0.000000e+00> : vector<16x64xf32>
    %184 = tpu.matmul %181, %183, %cst_73 {dimension_numbers = #tpu.dot_dimension_numbers<[1], [0], [0], [1], [0, 0, 1, 1], [], []>} : vector<16x32xf32>, vector<32x64xf32>, vector<16x64xf32> -> vector<16x64xf32>
    %c0_74 = arith.constant 0 : index
    %c0_75 = arith.constant 0 : index
    %c0_76 = arith.constant 0 : index
    %185 = vector.load %arg14[%c0_74, %c0_75, %c0_76] : memref<2x1x64xf32, #tpu.memory_space<vmem>>, vector<1x1x64xf32>
    %186 = vector.shape_cast %185 : vector<1x1x64xf32> to vector<1x64xf32>
    %187 = vector.broadcast %186 : vector<1x64xf32> to vector<16x64xf32>
    %188 = arith.addf %184, %187 : vector<16x64xf32>
    %cst_77 = arith.constant 5.000000e-01 : f32
    %189 = vector.broadcast %cst_77 : f32 to vector<16x64xf32>
    %190 = arith.mulf %189, %188 : vector<16x64xf32>
    %cst_78 = arith.constant 4.471500e-02 : f32
    %191 = vector.broadcast %cst_78 : f32 to vector<16x64xf32>
    %192 = arith.mulf %191, %188 : vector<16x64xf32>
    %193 = arith.mulf %192, %188 : vector<16x64xf32>
    %194 = arith.mulf %193, %188 : vector<16x64xf32>
    %195 = arith.addf %188, %194 : vector<16x64xf32>
    %cst_79 = arith.constant 0.797884583 : f32
    %196 = vector.broadcast %cst_79 : f32 to vector<16x64xf32>
    %197 = arith.mulf %196, %195 : vector<16x64xf32>
    %198 = math.tanh %197 : vector<16x64xf32>
    %cst_80 = arith.constant 1.000000e+00 : f32
    %199 = vector.broadcast %cst_80 : f32 to vector<16x64xf32>
    %200 = arith.addf %199, %198 : vector<16x64xf32>
    %201 = arith.mulf %190, %200 : vector<16x64xf32>
    %c0_81 = arith.constant 0 : index
    %c0_82 = arith.constant 0 : index
    %c0_83 = arith.constant 0 : index
    %202 = vector.load %arg15[%c0_81, %c0_82, %c0_83] : memref<2x64x32xf32, #tpu.memory_space<vmem>>, vector<1x64x32xf32>
    %203 = vector.shape_cast %202 : vector<1x64x32xf32> to vector<64x32xf32>
    %cst_84 = arith.constant dense<0.000000e+00> : vector<16x32xf32>
    %204 = tpu.matmul %201, %203, %cst_84 {dimension_numbers = #tpu.dot_dimension_numbers<[1], [0], [0], [1], [0, 0, 1, 1], [], []>} : vector<16x64xf32>, vector<64x32xf32>, vector<16x32xf32> -> vector<16x32xf32>
    %c0_85 = arith.constant 0 : index
    %c0_86 = arith.constant 0 : index
    %c0_87 = arith.constant 0 : index
    %205 = vector.load %arg16[%c0_85, %c0_86, %c0_87] : memref<2x1x32xf32, #tpu.memory_space<vmem>>, vector<1x1x32xf32>
    %206 = vector.shape_cast %205 : vector<1x1x32xf32> to vector<1x32xf32>
    %207 = vector.broadcast %206 : vector<1x32xf32> to vector<16x32xf32>
    %208 = arith.addf %204, %207 : vector<16x32xf32>
    %209 = arith.addf %181, %208 : vector<16x32xf32>
    %c0_88 = arith.constant 0 : index
    %c0_89 = arith.constant 0 : index
    %c0_90 = arith.constant 0 : index
    %210 = vector.load %arg17[%c0_88, %c0_89, %c0_90] : memref<2x1x32xf32, #tpu.memory_space<vmem>>, vector<1x1x32xf32>
    %211 = vector.shape_cast %210 : vector<1x1x32xf32> to vector<1x32xf32>
    %c0_91 = arith.constant 0 : index
    %c0_92 = arith.constant 0 : index
    %c0_93 = arith.constant 0 : index
    %212 = vector.load %arg18[%c0_91, %c0_92, %c0_93] : memref<2x1x32xf32, #tpu.memory_space<vmem>>, vector<1x1x32xf32>
    %213 = vector.shape_cast %212 : vector<1x1x32xf32> to vector<1x32xf32>
    %cst_94 = arith.constant dense<0.000000e+00> : vector<16xf32>
    %214 = vector.multi_reduction <add>, %209, %cst_94 [1] : vector<16x32xf32> to vector<16xf32>
    %215 = vector.shape_cast %214 : vector<16xf32> to vector<16x1xf32>
    %cst_95 = arith.constant 3.200000e+01 : f32
    %216 = vector.broadcast %cst_95 : f32 to vector<16x1xf32>
    %217 = arith.divf %215, %216 : vector<16x1xf32>
    %218 = vector.broadcast %217 : vector<16x1xf32> to vector<16x32xf32>
    %219 = arith.subf %209, %218 : vector<16x32xf32>
    %220 = arith.mulf %219, %219 : vector<16x32xf32>
    %cst_96 = arith.constant dense<0.000000e+00> : vector<16xf32>
    %221 = vector.multi_reduction <add>, %220, %cst_96 [1] : vector<16x32xf32> to vector<16xf32>
    %222 = vector.shape_cast %221 : vector<16xf32> to vector<16x1xf32>
    %cst_97 = arith.constant 3.200000e+01 : f32
    %223 = vector.broadcast %cst_97 : f32 to vector<16x1xf32>
    %224 = arith.divf %222, %223 : vector<16x1xf32>
    %cst_98 = arith.constant 9.99999996E-13 : f32
    %225 = vector.broadcast %cst_98 : f32 to vector<16x1xf32>
    %226 = arith.addf %224, %225 : vector<16x1xf32>
    %227 = math.rsqrt %226 : vector<16x1xf32>
    %228 = vector.broadcast %227 : vector<16x1xf32> to vector<16x32xf32>
    %229 = arith.mulf %219, %228 : vector<16x32xf32>
    %230 = vector.broadcast %211 : vector<1x32xf32> to vector<16x32xf32>
    %231 = arith.mulf %229, %230 : vector<16x32xf32>
    %232 = vector.broadcast %213 : vector<1x32xf32> to vector<16x32xf32>
    %233 = arith.addf %231, %232 : vector<16x32xf32>
    %c1 = arith.constant 1 : index
    %c0_99 = arith.constant 0 : index
    %c0_100 = arith.constant 0 : index
    %234 = vector.load %arg7[%c1, %c0_99, %c0_100] : memref<2x32x96xf32, #tpu.memory_space<vmem>>, vector<1x32x96xf32>
    %235 = vector.shape_cast %234 : vector<1x32x96xf32> to vector<32x96xf32>
    %c1_101 = arith.constant 1 : index
    %c0_102 = arith.constant 0 : index
    %c0_103 = arith.constant 0 : index
    %236 = vector.load %arg8[%c1_101, %c0_102, %c0_103] : memref<2x1x96xf32, #tpu.memory_space<vmem>>, vector<1x1x96xf32>
    %237 = vector.shape_cast %236 : vector<1x1x96xf32> to vector<1x96xf32>
    %c1_104 = arith.constant 1 : index
    %c0_105 = arith.constant 0 : index
    %c0_106 = arith.constant 0 : index
    %238 = vector.load %arg9[%c1_104, %c0_105, %c0_106] : memref<2x32x32xf32, #tpu.memory_space<vmem>>, vector<1x32x32xf32>
    %239 = vector.shape_cast %238 : vector<1x32x32xf32> to vector<32x32xf32>
    %c1_107 = arith.constant 1 : index
    %c0_108 = arith.constant 0 : index
    %c0_109 = arith.constant 0 : index
    %240 = vector.load %arg10[%c1_107, %c0_108, %c0_109] : memref<2x1x32xf32, #tpu.memory_space<vmem>>, vector<1x1x32xf32>
    %241 = vector.shape_cast %240 : vector<1x1x32xf32> to vector<1x32xf32>
    %cst_110 = arith.constant dense<0.000000e+00> : vector<16x96xf32>
    %242 = tpu.matmul %233, %235, %cst_110 {dimension_numbers = #tpu.dot_dimension_numbers<[1], [0], [0], [1], [0, 0, 1, 1], [], []>} : vector<16x32xf32>, vector<32x96xf32>, vector<16x96xf32> -> vector<16x96xf32>
    %243 = vector.broadcast %237 : vector<1x96xf32> to vector<16x96xf32>
    %244 = arith.addf %242, %243 : vector<16x96xf32>
    %245 = vector.extract_strided_slice %244 {offsets = [0, 0], sizes = [16, 32], strides = [1, 1]} : vector<16x96xf32> to vector<16x32xf32>
    %246 = vector.shape_cast %245 : vector<16x32xf32> to vector<2x8x32xf32>
    %247 = vector.extract_strided_slice %244 {offsets = [0, 32], sizes = [16, 32], strides = [1, 1]} : vector<16x96xf32> to vector<16x32xf32>
    %248 = vector.shape_cast %247 : vector<16x32xf32> to vector<2x8x32xf32>
    %249 = vector.extract_strided_slice %244 {offsets = [0, 64], sizes = [16, 32], strides = [1, 1]} : vector<16x96xf32> to vector<16x32xf32>
    %250 = vector.shape_cast %249 : vector<16x32xf32> to vector<2x8x32xf32>
    %251 = vector.extract_strided_slice %246 {offsets = [0, 0, 0], sizes = [2, 8, 8], strides = [1, 1, 1]} : vector<2x8x32xf32> to vector<2x8x8xf32>
    %252 = vector.extract_strided_slice %248 {offsets = [0, 0, 0], sizes = [2, 8, 8], strides = [1, 1, 1]} : vector<2x8x32xf32> to vector<2x8x8xf32>
    %253 = vector.extract_strided_slice %250 {offsets = [0, 0, 0], sizes = [2, 8, 8], strides = [1, 1, 1]} : vector<2x8x32xf32> to vector<2x8x8xf32>
    "tpu.trace_start"() <{level = 10 : i32, message = "bqd,bkd->bqk"}> : () -> ()
    %cst_111 = arith.constant dense<0.000000e+00> : vector<2x8x8xf32>
    %254 = tpu.matmul %251, %252, %cst_111 {dimension_numbers = #tpu.dot_dimension_numbers<[2], [2], [1], [1], [0, 0, 0, 1, 1, 1], [0], [0]>} : vector<2x8x8xf32>, vector<2x8x8xf32>, vector<2x8x8xf32> -> vector<2x8x8xf32>
    "tpu.trace_stop"() : () -> ()
    %cst_112 = arith.constant 0.353553385 : f32
    %255 = vector.broadcast %cst_112 : f32 to vector<2x8x8xf32>
    %256 = arith.mulf %254, %255 : vector<2x8x8xf32>
    %257 = vector.broadcast %46 : vector<2x1x8xf32> to vector<2x8x8xf32>
    %258 = arith.addf %256, %257 : vector<2x8x8xf32>
    %cst_113 = arith.constant dense<0xFF800000> : vector<2x8xf32>
    %259 = vector.multi_reduction <maximumf>, %258, %cst_113 [2] : vector<2x8x8xf32> to vector<2x8xf32>
    %260 = vector.shape_cast %259 : vector<2x8xf32> to vector<2x8x1xf32>
    %261 = vector.broadcast %260 : vector<2x8x1xf32> to vector<2x8x8xf32>
    %262 = arith.subf %258, %261 : vector<2x8x8xf32>
    %263 = math.exp %262 : vector<2x8x8xf32>
    %cst_114 = arith.constant dense<0.000000e+00> : vector<2x8xf32>
    %264 = vector.multi_reduction <add>, %263, %cst_114 [2] : vector<2x8x8xf32> to vector<2x8xf32>
    %265 = vector.shape_cast %264 : vector<2x8xf32> to vector<2x8x1xf32>
    %266 = tpu.reciprocal %265 {approx = true} : vector<2x8x1xf32> -> vector<2x8x1xf32>
    %267 = vector.broadcast %266 : vector<2x8x1xf32> to vector<2x8x8xf32>
    %268 = arith.mulf %263, %267 : vector<2x8x8xf32>
    "tpu.trace_start"() <{level = 10 : i32, message = "bqk,bkd->bqd"}> : () -> ()
    %cst_115 = arith.constant dense<0.000000e+00> : vector<2x8x8xf32>
    %269 = tpu.matmul %268, %253, %cst_115 {dimension_numbers = #tpu.dot_dimension_numbers<[2], [1], [1], [2], [0, 0, 0, 1, 1, 2], [0], [0]>} : vector<2x8x8xf32>, vector<2x8x8xf32>, vector<2x8x8xf32> -> vector<2x8x8xf32>
    "tpu.trace_stop"() : () -> ()
    %270 = vector.shape_cast %269 : vector<2x8x8xf32> to vector<16x8xf32>
    %271 = vector.extract_strided_slice %239 {offsets = [0, 0], sizes = [8, 32], strides = [1, 1]} : vector<32x32xf32> to vector<8x32xf32>
    %cst_116 = arith.constant dense<0.000000e+00> : vector<16x32xf32>
    %272 = tpu.matmul %270, %271, %cst_116 {dimension_numbers = #tpu.dot_dimension_numbers<[1], [0], [0], [1], [0, 0, 1, 1], [], []>} : vector<16x8xf32>, vector<8x32xf32>, vector<16x32xf32> -> vector<16x32xf32>
    %273 = vector.extract_strided_slice %246 {offsets = [0, 0, 8], sizes = [2, 8, 8], strides = [1, 1, 1]} : vector<2x8x32xf32> to vector<2x8x8xf32>
    %274 = vector.extract_strided_slice %248 {offsets = [0, 0, 8], sizes = [2, 8, 8], strides = [1, 1, 1]} : vector<2x8x32xf32> to vector<2x8x8xf32>
    %275 = vector.extract_strided_slice %250 {offsets = [0, 0, 8], sizes = [2, 8, 8], strides = [1, 1, 1]} : vector<2x8x32xf32> to vector<2x8x8xf32>
    "tpu.trace_start"() <{level = 10 : i32, message = "bqd,bkd->bqk"}> : () -> ()
    %cst_117 = arith.constant dense<0.000000e+00> : vector<2x8x8xf32>
    %276 = tpu.matmul %273, %274, %cst_117 {dimension_numbers = #tpu.dot_dimension_numbers<[2], [2], [1], [1], [0, 0, 0, 1, 1, 1], [0], [0]>} : vector<2x8x8xf32>, vector<2x8x8xf32>, vector<2x8x8xf32> -> vector<2x8x8xf32>
    "tpu.trace_stop"() : () -> ()
    %cst_118 = arith.constant 0.353553385 : f32
    %277 = vector.broadcast %cst_118 : f32 to vector<2x8x8xf32>
    %278 = arith.mulf %276, %277 : vector<2x8x8xf32>
    %279 = vector.broadcast %46 : vector<2x1x8xf32> to vector<2x8x8xf32>
    %280 = arith.addf %278, %279 : vector<2x8x8xf32>
    %cst_119 = arith.constant dense<0xFF800000> : vector<2x8xf32>
    %281 = vector.multi_reduction <maximumf>, %280, %cst_119 [2] : vector<2x8x8xf32> to vector<2x8xf32>
    %282 = vector.shape_cast %281 : vector<2x8xf32> to vector<2x8x1xf32>
    %283 = vector.broadcast %282 : vector<2x8x1xf32> to vector<2x8x8xf32>
    %284 = arith.subf %280, %283 : vector<2x8x8xf32>
    %285 = math.exp %284 : vector<2x8x8xf32>
    %cst_120 = arith.constant dense<0.000000e+00> : vector<2x8xf32>
    %286 = vector.multi_reduction <add>, %285, %cst_120 [2] : vector<2x8x8xf32> to vector<2x8xf32>
    %287 = vector.shape_cast %286 : vector<2x8xf32> to vector<2x8x1xf32>
    %288 = tpu.reciprocal %287 {approx = true} : vector<2x8x1xf32> -> vector<2x8x1xf32>
    %289 = vector.broadcast %288 : vector<2x8x1xf32> to vector<2x8x8xf32>
    %290 = arith.mulf %285, %289 : vector<2x8x8xf32>
    "tpu.trace_start"() <{level = 10 : i32, message = "bqk,bkd->bqd"}> : () -> ()
    %cst_121 = arith.constant dense<0.000000e+00> : vector<2x8x8xf32>
    %291 = tpu.matmul %290, %275, %cst_121 {dimension_numbers = #tpu.dot_dimension_numbers<[2], [1], [1], [2], [0, 0, 0, 1, 1, 2], [0], [0]>} : vector<2x8x8xf32>, vector<2x8x8xf32>, vector<2x8x8xf32> -> vector<2x8x8xf32>
    "tpu.trace_stop"() : () -> ()
    %292 = vector.shape_cast %291 : vector<2x8x8xf32> to vector<16x8xf32>
    %293 = vector.extract_strided_slice %239 {offsets = [8, 0], sizes = [8, 32], strides = [1, 1]} : vector<32x32xf32> to vector<8x32xf32>
    %cst_122 = arith.constant dense<0.000000e+00> : vector<16x32xf32>
    %294 = tpu.matmul %292, %293, %cst_122 {dimension_numbers = #tpu.dot_dimension_numbers<[1], [0], [0], [1], [0, 0, 1, 1], [], []>} : vector<16x8xf32>, vector<8x32xf32>, vector<16x32xf32> -> vector<16x32xf32>
    %295 = arith.addf %272, %294 : vector<16x32xf32>
    %296 = vector.extract_strided_slice %246 {offsets = [0, 0, 16], sizes = [2, 8, 8], strides = [1, 1, 1]} : vector<2x8x32xf32> to vector<2x8x8xf32>
    %297 = vector.extract_strided_slice %248 {offsets = [0, 0, 16], sizes = [2, 8, 8], strides = [1, 1, 1]} : vector<2x8x32xf32> to vector<2x8x8xf32>
    %298 = vector.extract_strided_slice %250 {offsets = [0, 0, 16], sizes = [2, 8, 8], strides = [1, 1, 1]} : vector<2x8x32xf32> to vector<2x8x8xf32>
    "tpu.trace_start"() <{level = 10 : i32, message = "bqd,bkd->bqk"}> : () -> ()
    %cst_123 = arith.constant dense<0.000000e+00> : vector<2x8x8xf32>
    %299 = tpu.matmul %296, %297, %cst_123 {dimension_numbers = #tpu.dot_dimension_numbers<[2], [2], [1], [1], [0, 0, 0, 1, 1, 1], [0], [0]>} : vector<2x8x8xf32>, vector<2x8x8xf32>, vector<2x8x8xf32> -> vector<2x8x8xf32>
    "tpu.trace_stop"() : () -> ()
    %cst_124 = arith.constant 0.353553385 : f32
    %300 = vector.broadcast %cst_124 : f32 to vector<2x8x8xf32>
    %301 = arith.mulf %299, %300 : vector<2x8x8xf32>
    %302 = vector.broadcast %46 : vector<2x1x8xf32> to vector<2x8x8xf32>
    %303 = arith.addf %301, %302 : vector<2x8x8xf32>
    %cst_125 = arith.constant dense<0xFF800000> : vector<2x8xf32>
    %304 = vector.multi_reduction <maximumf>, %303, %cst_125 [2] : vector<2x8x8xf32> to vector<2x8xf32>
    %305 = vector.shape_cast %304 : vector<2x8xf32> to vector<2x8x1xf32>
    %306 = vector.broadcast %305 : vector<2x8x1xf32> to vector<2x8x8xf32>
    %307 = arith.subf %303, %306 : vector<2x8x8xf32>
    %308 = math.exp %307 : vector<2x8x8xf32>
    %cst_126 = arith.constant dense<0.000000e+00> : vector<2x8xf32>
    %309 = vector.multi_reduction <add>, %308, %cst_126 [2] : vector<2x8x8xf32> to vector<2x8xf32>
    %310 = vector.shape_cast %309 : vector<2x8xf32> to vector<2x8x1xf32>
    %311 = tpu.reciprocal %310 {approx = true} : vector<2x8x1xf32> -> vector<2x8x1xf32>
    %312 = vector.broadcast %311 : vector<2x8x1xf32> to vector<2x8x8xf32>
    %313 = arith.mulf %308, %312 : vector<2x8x8xf32>
    "tpu.trace_start"() <{level = 10 : i32, message = "bqk,bkd->bqd"}> : () -> ()
    %cst_127 = arith.constant dense<0.000000e+00> : vector<2x8x8xf32>
    %314 = tpu.matmul %313, %298, %cst_127 {dimension_numbers = #tpu.dot_dimension_numbers<[2], [1], [1], [2], [0, 0, 0, 1, 1, 2], [0], [0]>} : vector<2x8x8xf32>, vector<2x8x8xf32>, vector<2x8x8xf32> -> vector<2x8x8xf32>
    "tpu.trace_stop"() : () -> ()
    %315 = vector.shape_cast %314 : vector<2x8x8xf32> to vector<16x8xf32>
    %316 = vector.extract_strided_slice %239 {offsets = [16, 0], sizes = [8, 32], strides = [1, 1]} : vector<32x32xf32> to vector<8x32xf32>
    %cst_128 = arith.constant dense<0.000000e+00> : vector<16x32xf32>
    %317 = tpu.matmul %315, %316, %cst_128 {dimension_numbers = #tpu.dot_dimension_numbers<[1], [0], [0], [1], [0, 0, 1, 1], [], []>} : vector<16x8xf32>, vector<8x32xf32>, vector<16x32xf32> -> vector<16x32xf32>
    %318 = arith.addf %295, %317 : vector<16x32xf32>
    %319 = vector.extract_strided_slice %246 {offsets = [0, 0, 24], sizes = [2, 8, 8], strides = [1, 1, 1]} : vector<2x8x32xf32> to vector<2x8x8xf32>
    %320 = vector.extract_strided_slice %248 {offsets = [0, 0, 24], sizes = [2, 8, 8], strides = [1, 1, 1]} : vector<2x8x32xf32> to vector<2x8x8xf32>
    %321 = vector.extract_strided_slice %250 {offsets = [0, 0, 24], sizes = [2, 8, 8], strides = [1, 1, 1]} : vector<2x8x32xf32> to vector<2x8x8xf32>
    "tpu.trace_start"() <{level = 10 : i32, message = "bqd,bkd->bqk"}> : () -> ()
    %cst_129 = arith.constant dense<0.000000e+00> : vector<2x8x8xf32>
    %322 = tpu.matmul %319, %320, %cst_129 {dimension_numbers = #tpu.dot_dimension_numbers<[2], [2], [1], [1], [0, 0, 0, 1, 1, 1], [0], [0]>} : vector<2x8x8xf32>, vector<2x8x8xf32>, vector<2x8x8xf32> -> vector<2x8x8xf32>
    "tpu.trace_stop"() : () -> ()
    %cst_130 = arith.constant 0.353553385 : f32
    %323 = vector.broadcast %cst_130 : f32 to vector<2x8x8xf32>
    %324 = arith.mulf %322, %323 : vector<2x8x8xf32>
    %325 = vector.broadcast %46 : vector<2x1x8xf32> to vector<2x8x8xf32>
    %326 = arith.addf %324, %325 : vector<2x8x8xf32>
    %cst_131 = arith.constant dense<0xFF800000> : vector<2x8xf32>
    %327 = vector.multi_reduction <maximumf>, %326, %cst_131 [2] : vector<2x8x8xf32> to vector<2x8xf32>
    %328 = vector.shape_cast %327 : vector<2x8xf32> to vector<2x8x1xf32>
    %329 = vector.broadcast %328 : vector<2x8x1xf32> to vector<2x8x8xf32>
    %330 = arith.subf %326, %329 : vector<2x8x8xf32>
    %331 = math.exp %330 : vector<2x8x8xf32>
    %cst_132 = arith.constant dense<0.000000e+00> : vector<2x8xf32>
    %332 = vector.multi_reduction <add>, %331, %cst_132 [2] : vector<2x8x8xf32> to vector<2x8xf32>
    %333 = vector.shape_cast %332 : vector<2x8xf32> to vector<2x8x1xf32>
    %334 = tpu.reciprocal %333 {approx = true} : vector<2x8x1xf32> -> vector<2x8x1xf32>
    %335 = vector.broadcast %334 : vector<2x8x1xf32> to vector<2x8x8xf32>
    %336 = arith.mulf %331, %335 : vector<2x8x8xf32>
    "tpu.trace_start"() <{level = 10 : i32, message = "bqk,bkd->bqd"}> : () -> ()
    %cst_133 = arith.constant dense<0.000000e+00> : vector<2x8x8xf32>
    %337 = tpu.matmul %336, %321, %cst_133 {dimension_numbers = #tpu.dot_dimension_numbers<[2], [1], [1], [2], [0, 0, 0, 1, 1, 2], [0], [0]>} : vector<2x8x8xf32>, vector<2x8x8xf32>, vector<2x8x8xf32> -> vector<2x8x8xf32>
    "tpu.trace_stop"() : () -> ()
    %338 = vector.shape_cast %337 : vector<2x8x8xf32> to vector<16x8xf32>
    %339 = vector.extract_strided_slice %239 {offsets = [24, 0], sizes = [8, 32], strides = [1, 1]} : vector<32x32xf32> to vector<8x32xf32>
    %cst_134 = arith.constant dense<0.000000e+00> : vector<16x32xf32>
    %340 = tpu.matmul %338, %339, %cst_134 {dimension_numbers = #tpu.dot_dimension_numbers<[1], [0], [0], [1], [0, 0, 1, 1], [], []>} : vector<16x8xf32>, vector<8x32xf32>, vector<16x32xf32> -> vector<16x32xf32>
    %341 = arith.addf %318, %340 : vector<16x32xf32>
    %342 = arith.addf %233, %341 : vector<16x32xf32>
    %343 = vector.broadcast %241 : vector<1x32xf32> to vector<16x32xf32>
    %344 = arith.addf %342, %343 : vector<16x32xf32>
    %c1_135 = arith.constant 1 : index
    %c0_136 = arith.constant 0 : index
    %c0_137 = arith.constant 0 : index
    %345 = vector.load %arg11[%c1_135, %c0_136, %c0_137] : memref<2x1x32xf32, #tpu.memory_space<vmem>>, vector<1x1x32xf32>
    %346 = vector.shape_cast %345 : vector<1x1x32xf32> to vector<1x32xf32>
    %c1_138 = arith.constant 1 : index
    %c0_139 = arith.constant 0 : index
    %c0_140 = arith.constant 0 : index
    %347 = vector.load %arg12[%c1_138, %c0_139, %c0_140] : memref<2x1x32xf32, #tpu.memory_space<vmem>>, vector<1x1x32xf32>
    %348 = vector.shape_cast %347 : vector<1x1x32xf32> to vector<1x32xf32>
    %cst_141 = arith.constant dense<0.000000e+00> : vector<16xf32>
    %349 = vector.multi_reduction <add>, %344, %cst_141 [1] : vector<16x32xf32> to vector<16xf32>
    %350 = vector.shape_cast %349 : vector<16xf32> to vector<16x1xf32>
    %cst_142 = arith.constant 3.200000e+01 : f32
    %351 = vector.broadcast %cst_142 : f32 to vector<16x1xf32>
    %352 = arith.divf %350, %351 : vector<16x1xf32>
    %353 = vector.broadcast %352 : vector<16x1xf32> to vector<16x32xf32>
    %354 = arith.subf %344, %353 : vector<16x32xf32>
    %355 = arith.mulf %354, %354 : vector<16x32xf32>
    %cst_143 = arith.constant dense<0.000000e+00> : vector<16xf32>
    %356 = vector.multi_reduction <add>, %355, %cst_143 [1] : vector<16x32xf32> to vector<16xf32>
    %357 = vector.shape_cast %356 : vector<16xf32> to vector<16x1xf32>
    %cst_144 = arith.constant 3.200000e+01 : f32
    %358 = vector.broadcast %cst_144 : f32 to vector<16x1xf32>
    %359 = arith.divf %357, %358 : vector<16x1xf32>
    %cst_145 = arith.constant 9.99999996E-13 : f32
    %360 = vector.broadcast %cst_145 : f32 to vector<16x1xf32>
    %361 = arith.addf %359, %360 : vector<16x1xf32>
    %362 = math.rsqrt %361 : vector<16x1xf32>
    %363 = vector.broadcast %362 : vector<16x1xf32> to vector<16x32xf32>
    %364 = arith.mulf %354, %363 : vector<16x32xf32>
    %365 = vector.broadcast %346 : vector<1x32xf32> to vector<16x32xf32>
    %366 = arith.mulf %364, %365 : vector<16x32xf32>
    %367 = vector.broadcast %348 : vector<1x32xf32> to vector<16x32xf32>
    %368 = arith.addf %366, %367 : vector<16x32xf32>
    %c1_146 = arith.constant 1 : index
    %c0_147 = arith.constant 0 : index
    %c0_148 = arith.constant 0 : index
    %369 = vector.load %arg13[%c1_146, %c0_147, %c0_148] : memref<2x32x64xf32, #tpu.memory_space<vmem>>, vector<1x32x64xf32>
    %370 = vector.shape_cast %369 : vector<1x32x64xf32> to vector<32x64xf32>
    %cst_149 = arith.constant dense<0.000000e+00> : vector<16x64xf32>
    %371 = tpu.matmul %368, %370, %cst_149 {dimension_numbers = #tpu.dot_dimension_numbers<[1], [0], [0], [1], [0, 0, 1, 1], [], []>} : vector<16x32xf32>, vector<32x64xf32>, vector<16x64xf32> -> vector<16x64xf32>
    %c1_150 = arith.constant 1 : index
    %c0_151 = arith.constant 0 : index
    %c0_152 = arith.constant 0 : index
    %372 = vector.load %arg14[%c1_150, %c0_151, %c0_152] : memref<2x1x64xf32, #tpu.memory_space<vmem>>, vector<1x1x64xf32>
    %373 = vector.shape_cast %372 : vector<1x1x64xf32> to vector<1x64xf32>
    %374 = vector.broadcast %373 : vector<1x64xf32> to vector<16x64xf32>
    %375 = arith.addf %371, %374 : vector<16x64xf32>
    %cst_153 = arith.constant 5.000000e-01 : f32
    %376 = vector.broadcast %cst_153 : f32 to vector<16x64xf32>
    %377 = arith.mulf %376, %375 : vector<16x64xf32>
    %cst_154 = arith.constant 4.471500e-02 : f32
    %378 = vector.broadcast %cst_154 : f32 to vector<16x64xf32>
    %379 = arith.mulf %378, %375 : vector<16x64xf32>
    %380 = arith.mulf %379, %375 : vector<16x64xf32>
    %381 = arith.mulf %380, %375 : vector<16x64xf32>
    %382 = arith.addf %375, %381 : vector<16x64xf32>
    %cst_155 = arith.constant 0.797884583 : f32
    %383 = vector.broadcast %cst_155 : f32 to vector<16x64xf32>
    %384 = arith.mulf %383, %382 : vector<16x64xf32>
    %385 = math.tanh %384 : vector<16x64xf32>
    %cst_156 = arith.constant 1.000000e+00 : f32
    %386 = vector.broadcast %cst_156 : f32 to vector<16x64xf32>
    %387 = arith.addf %386, %385 : vector<16x64xf32>
    %388 = arith.mulf %377, %387 : vector<16x64xf32>
    %c1_157 = arith.constant 1 : index
    %c0_158 = arith.constant 0 : index
    %c0_159 = arith.constant 0 : index
    %389 = vector.load %arg15[%c1_157, %c0_158, %c0_159] : memref<2x64x32xf32, #tpu.memory_space<vmem>>, vector<1x64x32xf32>
    %390 = vector.shape_cast %389 : vector<1x64x32xf32> to vector<64x32xf32>
    %cst_160 = arith.constant dense<0.000000e+00> : vector<16x32xf32>
    %391 = tpu.matmul %388, %390, %cst_160 {dimension_numbers = #tpu.dot_dimension_numbers<[1], [0], [0], [1], [0, 0, 1, 1], [], []>} : vector<16x64xf32>, vector<64x32xf32>, vector<16x32xf32> -> vector<16x32xf32>
    %c1_161 = arith.constant 1 : index
    %c0_162 = arith.constant 0 : index
    %c0_163 = arith.constant 0 : index
    %392 = vector.load %arg16[%c1_161, %c0_162, %c0_163] : memref<2x1x32xf32, #tpu.memory_space<vmem>>, vector<1x1x32xf32>
    %393 = vector.shape_cast %392 : vector<1x1x32xf32> to vector<1x32xf32>
    %394 = vector.broadcast %393 : vector<1x32xf32> to vector<16x32xf32>
    %395 = arith.addf %391, %394 : vector<16x32xf32>
    %396 = arith.addf %368, %395 : vector<16x32xf32>
    %c1_164 = arith.constant 1 : index
    %c0_165 = arith.constant 0 : index
    %c0_166 = arith.constant 0 : index
    %397 = vector.load %arg17[%c1_164, %c0_165, %c0_166] : memref<2x1x32xf32, #tpu.memory_space<vmem>>, vector<1x1x32xf32>
    %398 = vector.shape_cast %397 : vector<1x1x32xf32> to vector<1x32xf32>
    %c1_167 = arith.constant 1 : index
    %c0_168 = arith.constant 0 : index
    %c0_169 = arith.constant 0 : index
    %399 = vector.load %arg18[%c1_167, %c0_168, %c0_169] : memref<2x1x32xf32, #tpu.memory_space<vmem>>, vector<1x1x32xf32>
    %400 = vector.shape_cast %399 : vector<1x1x32xf32> to vector<1x32xf32>
    %cst_170 = arith.constant dense<0.000000e+00> : vector<16xf32>
    %401 = vector.multi_reduction <add>, %396, %cst_170 [1] : vector<16x32xf32> to vector<16xf32>
    %402 = vector.shape_cast %401 : vector<16xf32> to vector<16x1xf32>
    %cst_171 = arith.constant 3.200000e+01 : f32
    %403 = vector.broadcast %cst_171 : f32 to vector<16x1xf32>
    %404 = arith.divf %402, %403 : vector<16x1xf32>
    %405 = vector.broadcast %404 : vector<16x1xf32> to vector<16x32xf32>
    %406 = arith.subf %396, %405 : vector<16x32xf32>
    %407 = arith.mulf %406, %406 : vector<16x32xf32>
    %cst_172 = arith.constant dense<0.000000e+00> : vector<16xf32>
    %408 = vector.multi_reduction <add>, %407, %cst_172 [1] : vector<16x32xf32> to vector<16xf32>
    %409 = vector.shape_cast %408 : vector<16xf32> to vector<16x1xf32>
    %cst_173 = arith.constant 3.200000e+01 : f32
    %410 = vector.broadcast %cst_173 : f32 to vector<16x1xf32>
    %411 = arith.divf %409, %410 : vector<16x1xf32>
    %cst_174 = arith.constant 9.99999996E-13 : f32
    %412 = vector.broadcast %cst_174 : f32 to vector<16x1xf32>
    %413 = arith.addf %411, %412 : vector<16x1xf32>
    %414 = math.rsqrt %413 : vector<16x1xf32>
    %415 = vector.broadcast %414 : vector<16x1xf32> to vector<16x32xf32>
    %416 = arith.mulf %406, %415 : vector<16x32xf32>
    %417 = vector.broadcast %398 : vector<1x32xf32> to vector<16x32xf32>
    %418 = arith.mulf %416, %417 : vector<16x32xf32>
    %419 = vector.broadcast %400 : vector<1x32xf32> to vector<16x32xf32>
    %420 = arith.addf %418, %419 : vector<16x32xf32>
    %421 = vector.shape_cast %420 : vector<16x32xf32> to vector<2x8x32xf32>
    %422 = vector.extract_strided_slice %421 {offsets = [0, 0, 0], sizes = [2, 1, 32], strides = [1, 1, 1]} : vector<2x8x32xf32> to vector<2x1x32xf32>
    %423 = vector.shape_cast %422 : vector<2x1x32xf32> to vector<2x32xf32>
    %c0_175 = arith.constant 0 : index
    %c0_176 = arith.constant 0 : index
    %424 = vector.load %arg19[%c0_175, %c0_176] : memref<32x32xf32, #tpu.memory_space<vmem>>, vector<32x32xf32>
    %cst_177 = arith.constant dense<0.000000e+00> : vector<2x32xf32>
    %425 = tpu.matmul %423, %424, %cst_177 {dimension_numbers = #tpu.dot_dimension_numbers<[1], [0], [0], [1], [0, 0, 1, 1], [], []>} : vector<2x32xf32>, vector<32x32xf32>, vector<2x32xf32> -> vector<2x32xf32>
    %c0_178 = arith.constant 0 : index
    %c0_179 = arith.constant 0 : index
    %426 = vector.load %arg20[%c0_178, %c0_179] : memref<1x32xf32, #tpu.memory_space<vmem>>, vector<1x32xf32>
    %427 = vector.broadcast %426 : vector<1x32xf32> to vector<2x32xf32>
    %428 = arith.addf %425, %427 : vector<2x32xf32>
    %429 = math.tanh %428 : vector<2x32xf32>
    %c0_180 = arith.constant 0 : index
    %c0_181 = arith.constant 0 : index
    %430 = vector.load %arg21[%c0_180, %c0_181] : memref<2x2xf32, #tpu.memory_space<vmem>>, vector<2x2xf32>
    %c0_182 = arith.constant 0 : index
    %c0_183 = arith.constant 0 : index
    %431 = vector.load %arg22[%c0_182, %c0_183] : memref<2x16xf32, #tpu.memory_space<vmem>>, vector<2x16xf32>
    %cst_184 = arith.constant dense<0.000000e+00> : vector<2x16xf32>
    %432 = tpu.matmul %430, %431, %cst_184 {dimension_numbers = #tpu.dot_dimension_numbers<[1], [0], [0], [1], [0, 0, 1, 1], [], []>} : vector<2x2xf32>, vector<2x16xf32>, vector<2x16xf32> -> vector<2x16xf32>
    %c0_185 = arith.constant 0 : index
    %c0_186 = arith.constant 0 : index
    %433 = vector.load %arg23[%c0_185, %c0_186] : memref<1x16xf32, #tpu.memory_space<vmem>>, vector<1x16xf32>
    %434 = vector.broadcast %433 : vector<1x16xf32> to vector<2x16xf32>
    %435 = arith.addf %432, %434 : vector<2x16xf32>
    %cst_187 = arith.constant 0.000000e+00 : f32
    %436 = vector.broadcast %cst_187 : f32 to vector<2x16xf32>
    %437 = arith.maximumf %435, %436 : vector<2x16xf32>
    %c0_188 = arith.constant 0 : index
    %c0_189 = arith.constant 0 : index
    %438 = vector.load %arg24[%c0_188, %c0_189] : memref<16x16xf32, #tpu.memory_space<vmem>>, vector<16x16xf32>
    %cst_190 = arith.constant dense<0.000000e+00> : vector<2x16xf32>
    %439 = tpu.matmul %437, %438, %cst_190 {dimension_numbers = #tpu.dot_dimension_numbers<[1], [0], [0], [1], [0, 0, 1, 1], [], []>} : vector<2x16xf32>, vector<16x16xf32>, vector<2x16xf32> -> vector<2x16xf32>
    %c0_191 = arith.constant 0 : index
    %c0_192 = arith.constant 0 : index
    %440 = vector.load %arg25[%c0_191, %c0_192] : memref<1x16xf32, #tpu.memory_space<vmem>>, vector<1x16xf32>
    %441 = vector.broadcast %440 : vector<1x16xf32> to vector<2x16xf32>
    %442 = arith.addf %439, %441 : vector<2x16xf32>
    %c0_193 = arith.constant 0 : index
    %c0_194 = arith.constant 0 : index
    %443 = vector.load %arg26[%c0_193, %c0_194] : memref<48x2xf32, #tpu.memory_space<vmem>>, vector<48x2xf32>
    %444 = vector.extract_strided_slice %443 {offsets = [0, 0], sizes = [32, 2], strides = [1, 1]} : vector<48x2xf32> to vector<32x2xf32>
    %cst_195 = arith.constant dense<0.000000e+00> : vector<2x2xf32>
    %445 = tpu.matmul %429, %444, %cst_195 {dimension_numbers = #tpu.dot_dimension_numbers<[1], [0], [0], [1], [0, 0, 1, 1], [], []>} : vector<2x32xf32>, vector<32x2xf32>, vector<2x2xf32> -> vector<2x2xf32>
    %446 = vector.extract_strided_slice %443 {offsets = [32, 0], sizes = [16, 2], strides = [1, 1]} : vector<48x2xf32> to vector<16x2xf32>
    %cst_196 = arith.constant dense<0.000000e+00> : vector<2x2xf32>
    %447 = tpu.matmul %442, %446, %cst_196 {dimension_numbers = #tpu.dot_dimension_numbers<[1], [0], [0], [1], [0, 0, 1, 1], [], []>} : vector<2x16xf32>, vector<16x2xf32>, vector<2x2xf32> -> vector<2x2xf32>
    %448 = arith.addf %445, %447 : vector<2x2xf32>
    %c0_197 = arith.constant 0 : index
    %c0_198 = arith.constant 0 : index
    %449 = vector.load %arg27[%c0_197, %c0_198] : memref<1x2xf32, #tpu.memory_space<vmem>>, vector<1x2xf32>
    %450 = vector.broadcast %449 : vector<1x2xf32> to vector<2x2xf32>
    %451 = arith.addf %448, %450 : vector<2x2xf32>
    %c0_199 = arith.constant 0 : index
    %c0_200 = arith.constant 0 : index
    %452 = vector.load %arg28[%c0_199, %c0_200] : memref<2x2xf32, #tpu.memory_space<vmem>>, vector<2x2xf32>
    tpu.vector_store %arg28[%c0_199, %c0_200], %451 {strides = array<i32>} : memref<2x2xf32, #tpu.memory_space<vmem>>, vector<2x2xf32>,
    return
  }
}

</mosaic_0001>

<bundles_post_ra>
// kernel: bert_with_time_series_forward.1
= control target key start
LH: loop header
LB: loop body
LE: loop exit
PB: predicated region body
PF: predicated region fallthrough
CT: control target
= control target key end

     0   :  { %v2472_v0 = vmov 0   ;;  %v91_v19 = vlaneseq  ;;  %v2473_v22 = vmov 1.0   ;;  %vm150_vm2 = vcmask 261120   ;;  %s3241_s0 = inlined_call_operand.vmem [shape: s32[16,1], index: 0, kind: input, shape index: {}]   ;;  %s3242_s2 = inlined_call_operand.vmem [shape: f32[128,32], index: 2, kind: input, shape index: {}]   ;;  %s3243_s4 = inlined_call_operand.vmem [shape: f32[2,32], index: 4, kind: input, shape index: {}]   ;;  %s3244_s3 = inlined_call_operand.vmem [shape: f32[16,32], index: 3, kind: input, shape index: {}]   ;;  %s3245_s5 = inlined_call_operand.vmem [shape: f32[1,32], index: 5, kind: input, shape index: {}]   ;;  %s3246_s6 = inlined_call_operand.vmem [shape: f32[1,32], index: 6, kind: input, shape index: {}]   ;;  %s3247_s8 = inlined_call_operand.vmem [shape: f32[2,1,96], index: 8, kind: input, shape index: {}]   ;;  %s3248_s7 = inlined_call_operand.vmem [shape: f32[2,32,96], index: 7, kind: input, shape index: {}]   ;;  %s3249_s1 = inlined_call_operand.vmem [shape: s32[2,8], index: 1, kind: input, shape index: {}]   ;;  %s3250_s9 = inlined_call_operand.vmem [shape: f32[2,32,32], index: 9, kind: input, shape index: {}]   ;;  %s3251_s10 = inlined_call_operand.vmem [shape: f32[2,1,32], index: 10, kind: input, shape index: {}]   ;;  %s3252_s11 = inlined_call_operand.vmem [shape: f32[2,1,32], index: 11, kind: input, shape index: {}]   ;;  %s3253_s12 = inlined_call_operand.vmem [shape: f32[2,1,32], index: 12, kind: input, shape index: {}]   ;;  %s3254_s14 = inlined_call_operand.vmem [shape: f32[2,1,64], index: 14, kind: input, shape index: {}]   ;;  %s3255_s13 = inlined_call_operand.vmem [shape: f32[2,32,64], index: 13, kind: input, shape index: {}]   ;;  %s3256_s16 = inlined_call_operand.vmem [shape: f32[2,1,32], index: 16, kind: input, shape index: {}]   ;;  %s3257_s15 = inlined_call_operand.vmem [shape: f32[2,64,32], index: 15, kind: input, shape index: {}]   ;;  %s3258_s17 = inlined_call_operand.vmem [shape: f32[2,1,32], index: 17, kind: input, shape index: {}]   ;;  %s3259_s18 = inlined_call_operand.vmem [shape: f32[2,1,32], index: 18, kind: input, shape index: {}]   ;;  %s3260_s20 = inlined_call_operand.vmem [shape: f32[1,32], index: 20, kind: input, shape index: {}]   ;;  %s3261_s19 = inlined_call_operand.vmem [shape: f32[32,32], index: 19, kind: input, shape index: {}]   ;;  %s3262_s22 = inlined_call_operand.vmem [shape: f32[2,16], index: 22, kind: input, shape index: {}]   ;;  %s3263_s23 = inlined_call_operand.vmem [shape: f32[1,16], index: 23, kind: input, shape index: {}]   ;;  %s3264_s21 = inlined_call_operand.vmem [shape: f32[2,2], index: 21, kind: input, shape index: {}]   ;;  %s3265_s25 = inlined_call_operand.vmem [shape: f32[1,16], index: 25, kind: input, shape index: {}]   ;;  %s3266_s26 = inlined_call_operand.vmem [shape: f32[48,2], index: 26, kind: input, shape index: {}]   ;;  %s3267_s24 = inlined_call_operand.vmem [shape: f32[16,16], index: 24, kind: input, shape index: {}]   ;;  %s3268_s27 = inlined_call_operand.vmem [shape: f32[1,2], index: 27, kind: input, shape index: {}]   ;;  %s3269_s28 = inlined_call_operand.vmem [shape: f32[2,2], index: 28, kind: output, shape index: {}]  }
   0x1   :  { %3300 = sst [smem:[#allocation2_spill]] %s3241_s0  ;;  %2352 = vset.pattern.permute.xlu0 %v2472_v0  ;;  %v2474_v33 = vmov 32.0   ;;  %s3298_s0 = smov 88   ;;  %vm263_vm10 = vcmask 64512   ;;  %vm1049_vm14 = vcmask 523264  }
   0x2   :  { %3301 = sst [smem:[#allocation3_spill]] %s3242_s2  ;;  %v92_v20 = vand.u32 127, %v91_v19  ;;  %2376 = vrcp.f32 %v2474_v33  ;;  %s3286_s2 = smov 56  }
   0x3   :  { %3302 = sst [smem:[#allocation4_spill]] %s3243_s4  ;;  %s3294_s4 = smov 120  }
   0x4   :  { %3303 = sst [smem:[#allocation5_spill]] %s3244_s3 }
   0x5   :  { %3304 = sst [smem:[#allocation6_spill]] %s3245_s5 }
   0x6   :  { %3305 = sst [smem:[#allocation7_spill]] %s3246_s6  ;;  %s3282_s6 = smov 40  }
   0x7   :  { %3306 = sst [smem:[#allocation8_spill]] %s3247_s8 }
   0x8   :  { %3307 = sst [smem:[#allocation9_spill]] %s3248_s7  ;;  %v2377_v34 = vpop.eup %2376  ;;  %s3292_s7 = smov 64  }
   0x9   :  { %3308 = sst [smem:[#allocation10_spill]] %s3249_s1  ;;  %v158_v35 = vmul.f32 32.0, %v2377_v34  ;;  %vm162_vm3 = vweird.f32 %v2377_v34  ;;  %s3290_s1 = smov 112  }
   0xa   :  { %3309 = sst [smem:[#allocation11_spill]] %s3250_s9 }
   0xb   :  { %3310 = sst [smem:[#allocation12_spill]] %s3251_s10  ;;  %v159_v36 = vsub.f32 1.0, %v158_v35  ;;  %s3296_s10 = smov 96  }
   0xc   :  { %3311 = sst [smem:[#allocation13_spill]] %s3252_s11  ;;  %s3335_s11 = smov 104  }
   0xd   :  { %3312 = sst [smem:[#allocation14_spill]] %s3253_s12  ;;  %v160_v37 = vmul.f32 %v2377_v34, %v159_v36 }
   0xe   :  { %3313 = sst [smem:[#allocation15_spill]] %s3269_s28  ;;  %s3332_s28 = smov 80  }
   0xf   :  { %s3314_s9 = sld [smem:[#allocation2_spill]]  ;;  %v161_v38 = vadd.f32 %v2377_v34, %v160_v37 }
  0x10   :  { %s3315_s8 = sld [smem:[#allocation3_spill]] }
  0x11   :  { %s3316_s12 = sld [smem:[#allocation4_spill]]  ;;  %v2693_v39 = vsel %vm162_vm3, %v2377_v34, %v161_v38 }
  0x12   :  { %s3317_s5 = sld [smem:[#allocation5_spill]] }
  0x13   :  { %s3318_s30 = sld [smem:[#allocation9_spill]] }
  0x14   :  { %s3321_s3 = sld [smem:[#allocation8_spill]] }
  0x15   :  { %v89_v1 = vld [vmem:[%s3314_s9] sm:$0xff]  ;;  %v90_v6 = vld [vmem:[%s3314_s9 + $0x8] sm:$0xff]  ;;  %s3322_s29 = sld [smem:[#allocation10_spill]] }
  0x16   :  { %v118_v2 = vld [vmem:[%s3315_s8 + $0x78] sm:$0xff]  ;;  %94 = vperm.xlu0 %2352, %v89_v1   ;;  %v117_v3 = vld [vmem:[%s3315_s8 + $0x70] sm:$0xff]  ;;  %v116_v4 = vld [vmem:[%s3315_s8 + $0x68] sm:$0xff]  ;;  %s3323_s9 = sld [smem:[#allocation11_spill]] }
  0x17   :  { %119 = vmatpush.msra.mxu0 %v118_v2  ;;  %v115_v5 = vld [vmem:[%s3315_s8 + $0x60] sm:$0xff]  ;;  %v114_v7 = vld [vmem:[%s3315_s8 + $0x58] sm:$0xff]  ;;  %v113_v8 = vld [vmem:[%s3315_s8 + $0x50] sm:$0xff] }
  0x18   :  { %v112_v9 = vld [vmem:[%s3315_s8 + $0x48] sm:$0xff]  ;;  %v111_v10 = vld [vmem:[%s3315_s8 + $0x40] sm:$0xff]  ;;  %v110_v11 = vld [vmem:[%s3315_s8 + $0x38] sm:$0xff] }
  0x19   :  { %120 = vmatpush.msra.mxu0 %v117_v3  ;;  %v109_v12 = vld [vmem:[%s3315_s8 + $0x30] sm:$0xff]  ;;  %v108_v13 = vld [vmem:[%s3315_s8 + $0x28] sm:$0xff]  ;;  %v107_v14 = vld [vmem:[%s3315_s8 + $0x20] sm:$0xff] }
  0x1a   :  { %v106_v15 = vld [vmem:[%s3315_s8 + $0x18] sm:$0xff]  ;;  %v105_v16 = vld [vmem:[%s3315_s8 + $0x10] sm:$0xff]  ;;  %v104_v17 = vld [vmem:[%s3315_s8 + $0x8] sm:$0xff] }
  0x1b   :  { %121 = vmatpush.msra.mxu0 %v116_v4  ;;  %v103_v18 = vld [vmem:[%s3315_s8] sm:$0xff]  ;;  %v221_v50 = vld [vmem:[%s3318_s30 + $0x18] sm:$0xff]  ;;  %v220_v51 = vld [vmem:[%s3318_s30 + $0x10] sm:$0xff]  ;;  %s3278_s8 = smov 72  }
  0x1c   :  { %v2353_v24 = vld [vmem:[%s3316_s12] ss:$0 sm:$0xff]  ;;  %249 = vmatpush.msra.mxu1 %v221_v50  ;;  %v219_v52 = vld [vmem:[%s3318_s30 + $0x8] sm:$0xff]  ;;  %s3319_s12 = sld [smem:[#allocation6_spill]] }
  0x1d   :  { %122 = vmatpush.msra.mxu0 %v115_v5  ;;  %v142_v25 = vld [vmem:[%s3317_s5] sm:$0xff]  ;;  %s3320_s5 = sld [smem:[#allocation7_spill]] }
  0x1e   :  { %97 = vperm.xlu0 %2352, %v90_v6   ;;  %v145_v26 = vadd.f32 %v2353_v24, %v142_v25  ;;  %250 = vmatpush.msra.mxu1 %v220_v51  ;;  %v218_v53 = vld [vmem:[%s3318_s30] sm:$0xff] }
  0x1f   :  { %123 = vmatpush.msra.mxu0 %v114_v7  ;;  %v212_v25 = vld [vmem:[%s3322_s29] sm:$0x3]  ;;  %s3284_s29 = smov 48  }
  0x20   :  { %251 = vmatpush.msra.mxu1 %v219_v52 }
  0x21   :  { %124 = vmatpush.msra.mxu0 %v113_v8 }
  0x22   :  { %252 = vmatpush.msra.mxu1 %v218_v53  ;;  %v2354_v4 = vld [vmem:[%s3319_s12] ss:$0 sm:$0xff]  ;;  %s3288_s12 = smov 80  }
  0x23   :  { %125 = vmatpush.msra.mxu0 %v112_v9  ;;  %v2355_v8 = vld [vmem:[%s3320_s5] ss:$0 sm:$0xff]  ;;  %s3280_s5 = smov 104  }
  0x25   :  { %126 = vmatpush.msra.mxu0 %v111_v10 }
  0x27   :  { %127 = vmatpush.msra.mxu0 %v110_v11 }
  0x29   :  { %128 = vmatpush.msra.mxu0 %v109_v12 }
  0x2b   :  { %129 = vmatpush.msra.mxu0 %v108_v13 }
  0x2d   :  { %130 = vmatpush.msra.mxu0 %v107_v14 }
  0x2f   :  { %131 = vmatpush.msra.mxu0 %v106_v15 }
  0x31   :  { %132 = vmatpush.msra.mxu0 %v105_v16 }
  0x33   :  { %133 = vmatpush.msra.mxu0 %v104_v17 }
  0x35   :  { %134 = vmatpush.msra.mxu0 %v103_v18  ;;  %v2356_v18 = vld [vmem:[%s3321_s3] ss:$0 sm:$0xff] }
  0x88   :  { %v95_v21 = vpop.permute.xlu0 %94 }
  0x89   :  { %vm99_vm0 = vcmp.eq.s32.totalorder %v95_v21, %v92_v20 }
  0x8a   :  { %2226 = vmatmul.msk.f32.vlgmr.msra.gmra.mxu0 %vm99_vm0, %v2473_v22 }
  0x90   :  { %v98_v23 = vpop.permute.xlu0 %97 }
  0x91   :  { %vm100_vm1 = vcmp.eq.s32.totalorder %v98_v23, %v92_v20 }
  0x92   :  { %2227 = vmatmul.msk.f32.gmra.mxu0 %vm100_vm1, %v2473_v22 }
 0x107   :  { %v136_v27 = vpop.f32.mrf.mxu0 }
 0x108   :  { %v146_v28 = vadd.f32 %v145_v26, %v136_v27 }
 0x10a   :  { %v151_v29 = vsel %vm150_vm2, %v146_v28, 0.0 }
 0x10b   :  { %152 = vadd.xlane.f32.xlu1 %v151_v29 }
 0x10f   :  { %v139_v30 = vpop.f32.mrf.mxu0 }
 0x110   :  { %v147_v31 = vadd.f32 %v145_v26, %v139_v30  ;;  %v213_v26 = vcvt.s32.f32 %v212_v25 }
 0x112   :  { %v154_v32 = vsel %vm150_vm2, %v147_v31, 0.0  ;;  %v214_v27 = vsub.f32 1.0, %v213_v26 }
 0x113   :  { %155 = vadd.xlane.f32.xlu1 %v154_v32 }
 0x17e   :  { %v153_v40 = vpop.xlane.xlu1 %152 }
 0x17f   :  { %v164_v41 = vmul.f32 %v2693_v39, %v153_v40 }
 0x181   :  { %v166_v42 = vsub.f32 %v146_v28, %v164_v41  ;;  %v215_v28 = vmul.f32 -1e+09, %v214_v27 }
 0x183   :  { %v168_v43 = vmul.f32 %v166_v42, %v166_v42  ;;  %v2749_v29 = vperm.slane %v215_v28, 0  ;;  %v217_v33 = vrot.slane %v215_v28, 1 }
 0x185   :  { %v170_v44 = vsel %vm150_vm2, %v168_v43, 0.0  ;;  %v2753_v35 = vperm.slane %v217_v33, 0 }
 0x186   :  { %171 = vadd.xlane.f32.xlu2 %v170_v44  ;;  %v156_v45 = vpop.xlane.xlu1 %155 }
 0x187   :  { %v165_v46 = vmul.f32 %v2693_v39, %v156_v45 }
 0x189   :  { %v167_v47 = vsub.f32 %v147_v31, %v165_v46 }
 0x18b   :  { %v169_v48 = vmul.f32 %v167_v47, %v167_v47 }
 0x18d   :  { %v173_v49 = vsel %vm150_vm2, %v169_v48, 0.0 }
 0x18e   :  { %174 = vadd.xlane.f32.xlu2 %v173_v49 }
 0x1f9   :  { %v172_v54 = vpop.xlane.xlu2 %171 }
 0x1fa   :  { %v176_v55 = vmul.f32 %v172_v54, %v2693_v39 }
 0x1fc   :  { %v178_v56 = vadd.f32 1e-12, %v176_v55 }
 0x1fe   :  { %2378 = vrsqrt.f32 %v178_v56  ;;  %vm186_vm5 = vweird.f32 %v178_v56 }
 0x201   :  { %v175_v57 = vpop.xlane.xlu2 %174 }
 0x202   :  { %v177_v58 = vmul.f32 %v175_v57, %v2693_v39 }
 0x204   :  { %v2379_v59 = vpop.eup %2378  ;;  %v179_v60 = vadd.f32 1e-12, %v177_v58 }
 0x205   :  { %v181_v61 = vmul.f32 %v2379_v59, %v178_v56  ;;  %vm187_vm4 = vweird.f32 %v2379_v59 }
 0x206   :  { %2380 = vrsqrt.f32 %v179_v60  ;;  %vm188_vm6 = vmor %vm186_vm5, %vm187_vm4  ;;  %vm196_vm8 = vweird.f32 %v179_v60 }
 0x207   :  { %v182_v62 = vmul.f32 %v2379_v59, %v181_v61 }
 0x209   :  { %v183_v63 = vmul.f32 0.5, %v182_v62 }
 0x20b   :  { %v184_v0 = vsub.f32 1.5, %v183_v63 }
 0x20c   :  { %v2381_v1 = vpop.eup %2380 }
 0x20d   :  { %v185_v2 = vmul.f32 %v2379_v59, %v184_v0  ;;  %v191_v3 = vmul.f32 %v2381_v1, %v179_v60  ;;  %vm197_vm7 = vweird.f32 %v2381_v1 }
 0x20e   :  { %vm198_vm9 = vmor %vm196_vm8, %vm197_vm7 }
 0x20f   :  { %v189_v5 = vsel %vm188_vm6, %v2379_v59, %v185_v2  ;;  %v192_v6 = vmul.f32 %v2381_v1, %v191_v3 }
 0x210   :  { %v200_v7 = vmul.f32 %v189_v5, %v166_v42 }
 0x211   :  { %v193_v9 = vmul.f32 0.5, %v192_v6 }
 0x212   :  { %v205_v10 = vmul.f32 %v2354_v4, %v200_v7 }
 0x213   :  { %v194_v11 = vsub.f32 1.5, %v193_v9 }
 0x214   :  { %v2719_v12 = vadd.f32 %v2355_v8, %v205_v10 }
 0x215   :  { %v195_v13 = vmul.f32 %v2381_v1, %v194_v11 }
 0x216   :  { %2228 = vmatmul.msk.f32.vlgmr.msra.gmra.mxu1 %vm150_vm2, %v2719_v12 }
 0x217   :  { %v199_v14 = vsel %vm198_vm9, %v2381_v1, %v195_v13 }
 0x218   :  { %v201_v15 = vmul.f32 %v199_v14, %v167_v47 }
 0x21a   :  { %v206_v16 = vmul.f32 %v2354_v4, %v201_v15 }
 0x21c   :  { %v2723_v17 = vadd.f32 %v2355_v8, %v206_v16 }
 0x21e   :  { %2229 = vmatmul.msk.f32.gmra.mxu1 %vm150_vm2, %v2723_v17 }
 0x293   :  { %v254_v19 = vpop.f32.mrf.mxu1 }
 0x294   :  { %v2730_v20 = vadd.f32 %v2356_v18, %v254_v19 }
 0x296   :  { %261 = vrot.lane.b32.xlu1 %v2730_v20, %s3296_s10 }
 0x29b   :  { %v257_v21 = vpop.f32.mrf.mxu1 }
 0x29c   :  { %v2734_v22 = vadd.f32 %v2356_v18, %v257_v21 }
 0x29e   :  { %427 = vrot.lane.b32.xlu1 %v2734_v22, %s3298_s0  ;;  %289 = vrot.lane.b32.xlu0 %v2734_v22, %s3296_s10  ;;  %s3331_s10 = smov 112  }
 0x308   :  { %v262_v23 = vpop.permute.xlu1 %261 }
 0x309   :  { %2230 = vmatpush.xpose.msk.msra.mxu2 %vm263_vm10, %v262_v23 }
 0x30c   :  { %2231 = vmatmul.msk.f32.vlgmr.msra.gmra.mxu2 %vm263_vm10, %v2730_v20 }
 0x310   :  { %v290_v24 = vpop.permute.xlu0 %289  ;;  %v428_v41 = vpop.permute.xlu1 %427 }
 0x311   :  { %2232 = vmatpush.xpose.msk.msra.mxu3 %vm263_vm10, %v290_v24 }
 0x314   :  { %2233 = vmatmul.msk.f32.vlgmr.msra.gmra.mxu3 %vm263_vm10, %v2734_v22 }
 0x38f   :  { %v285_v30 = vpop.f32.mrf.mxu2 }
 0x390   :  { %v315_v31 = vmul.f32 0.35355338, %v285_v30 }
 0x392   :  { %v321_v32 = vadd.f32 %v2749_v29, %v315_v31 }
 0x394   :  { %v323_v34 = vsel %vm263_vm10, %v321_v32, -inf }
 0x395   :  { %324 = vmax.xlane.f32.xlu1 %v323_v34 }
 0x397   :  { %v312_v36 = vpop.f32.mrf.mxu3 }
 0x398   :  { %v316_v37 = vmul.f32 0.35355338, %v312_v36 }
 0x39a   :  { %v322_v38 = vadd.f32 %v2753_v35, %v316_v37 }
 0x39c   :  { %v326_v40 = vsel %vm263_vm10, %v322_v38, -inf }
 0x39d   :  { %327 = vmax.xlane.f32.xlu2 %v326_v40 }
 0x3ae   :  { %397 = vrot.lane.b32.xlu1 %v2730_v20, %s3294_s4 }
 0x3b5   :  { %371 = vrot.lane.b32.xlu2 %v2734_v22, %s3292_s7 }
 0x3b6   :  { %591 = vrot.lane.b32.xlu1 %v2730_v20, %s3288_s12 }
 0x3bd   :  { %425 = vrot.lane.b32.xlu2 %v2734_v22, %s3294_s4 }
 0x3be   :  { %589 = vrot.lane.b32.xlu1 %v2730_v20, %s3290_s1 }
 0x408   :  { %v325_v42 = vpop.xlane.xlu1 %324 }
 0x409   :  { %v329_v43 = vsub.f32 %v321_v32, %v325_v42  ;;  %v223_v42 = vld [vmem:[%s3323_s9] sm:$0xff] }
 0x40b   :  { %v331_v44 = vmul.f32 1.442695, %v329_v43 }
 0x40d   :  { %2382 = vpow2.f32 %v331_v44 }
 0x410   :  { %v328_v45 = vpop.xlane.xlu2 %327 }
 0x411   :  { %v330_v46 = vsub.f32 %v322_v38, %v328_v45 }
 0x413   :  { %v2383_v47 = vpop.eup %2382  ;;  %v333_v48 = vmul.f32 1.442695, %v330_v46 }
 0x414   :  { %v335_v49 = vsel %vm263_vm10, %v2383_v47, 0.0 }
 0x415   :  { %2384 = vpow2.f32 %v333_v48  ;;  %336 = vadd.xlane.f32.xlu2 %v335_v49 }
 0x418   :  { %v372_v50 = vpop.permute.xlu2 %371 }
 0x419   :  { %392 = vmatpush.msrb.mxu3 %v372_v50 }
 0x41b   :  { %2238 = vmatpush.xpose.msk.msra.mxu3 %vm263_vm10, %v428_v41  ;;  %v2385_v51 = vpop.eup %2384 }
 0x41c   :  { %v338_v52 = vsel %vm263_vm10, %v2385_v51, 0.0 }
 0x41d   :  { %339 = vadd.xlane.f32.xlu0 %v338_v52 }
 0x420   :  { %v426_v53 = vpop.permute.xlu2 %425  ;;  %v398_v62 = vpop.permute.xlu1 %397 }
 0x428   :  { %v592_v19 = vpop.permute.xlu1 %591 }
 0x430   :  { %v590_v25 = vpop.permute.xlu1 %589 }
 0x431   :  { %345 = vrot.lane.b32.xlu0 %v2730_v20, %s3292_s7  ;;  %s3328_s7 = smov 96  }
 0x439   :  { %399 = vrot.lane.b32.xlu0 %v2730_v20, %s3298_s0  ;;  %s3333_s0 = smov 56  }
 0x488   :  { %v337_v56 = vpop.xlane.xlu2 %336 }
 0x490   :  { %v340_v54 = vpop.xlane.xlu0 %339 }
 0x491   :  { %2386 = vrcp.f32 %v340_v54  ;;  %v224_v54 = vld [vmem:[%s3323_s9 + $0x8] sm:$0xff] }
 0x492   :  { %2388 = vrcp.f32 %v337_v56 }
 0x497   :  { %v2387_v55 = vpop.eup %2386 }
 0x498   :  { %v344_v57 = vmul.f32 %v2387_v55, %v2385_v51  ;;  %v2389_v58 = vpop.eup %2388 }
 0x499   :  { %v343_v60 = vmul.f32 %v2389_v58, %v2383_v47 }
 0x49a   :  { %2235 = vmatmul.msk.f32.vlgmr.msrb.gmra.mxu3 %vm263_vm10, %v344_v57 }
 0x49b   :  { %552 = vmatpush.msrb.mxu3 %v224_v54 }
 0x4a2   :  { %2239 = vmatmul.msk.f32.vlgmr.msra.gmra.mxu3 %vm263_vm10, %v426_v53 }
 0x4a3   :  { %v346_v59 = vpop.permute.xlu0 %345 }
 0x4a4   :  { %366 = vmatpush.msrb.mxu2 %v346_v59 }
 0x4a5   :  { %2234 = vmatmul.msk.f32.vlgmr.msrb.gmra.mxu2 %vm263_vm10, %v343_v60 }
 0x4ab   :  { %v400_v61 = vpop.permute.xlu0 %399 }
 0x4ac   :  { %2236 = vmatpush.xpose.msk.msra.mxu2 %vm263_vm10, %v400_v61 }
 0x4af   :  { %2237 = vmatmul.msk.f32.vlgmr.msra.gmra.mxu2 %vm263_vm10, %v398_v62 }
 0x51d   :  { %v2779_v63 = vpop.f32.mrf.mxu3 }
 0x525   :  { %v450_v0 = vpop.f32.mrf.mxu3 }
 0x526   :  { %v454_v1 = vmul.f32 0.35355338, %v450_v0 }
 0x528   :  { %v456_v2 = vadd.f32 %v454_v1, %v2753_v35  ;;  %v368_v10 = vpop.f32.mrf.mxu2 }
 0x52a   :  { %v460_v3 = vsel %vm263_vm10, %v456_v2, -inf }
 0x52b   :  { %461 = vmax.xlane.f32.xlu0 %v460_v3 }
 0x532   :  { %v422_v11 = vpop.f32.mrf.mxu2 }
 0x533   :  { %v453_v13 = vmul.f32 0.35355338, %v422_v11 }
 0x535   :  { %v455_v14 = vadd.f32 %v453_v13, %v2749_v29 }
 0x537   :  { %v457_v15 = vsel %vm263_vm10, %v455_v14, -inf }
 0x53f   :  { %479 = vrot.lane.b32.xlu0 %v2730_v20, %s3286_s2 }
 0x547   :  { %619 = vrot.lane.b32.xlu0 %v2734_v22, %s3288_s12 }
 0x54f   :  { %617 = vrot.lane.b32.xlu0 %v2734_v22, %s3290_s1  ;;  %s3329_s1 = smov 120  }
 0x557   :  { %754 = vrot.lane.b32.xlu0 %v2730_v20, %s3280_s5 }
 0x59e   :  { %v462_v4 = vpop.xlane.xlu0 %461 }
 0x59f   :  { %v464_v5 = vsub.f32 %v456_v2, %v462_v4 }
 0x5a1   :  { %v467_v6 = vmul.f32 1.442695, %v464_v5 }
 0x5a3   :  { %2390 = vpow2.f32 %v467_v6 }
 0x5a9   :  { %v2391_v7 = vpop.eup %2390 }
 0x5aa   :  { %v472_v8 = vsel %vm263_vm10, %v2391_v7, 0.0 }
 0x5ab   :  { %473 = vadd.xlane.f32.xlu2 %v472_v8 }
 0x5b1   :  { %v480_v9 = vpop.permute.xlu0 %479 }
 0x5b2   :  { %500 = vmatpush.msrb.mxu1 %v480_v9 }
 0x5b4   :  { %581 = vmatpush.msra.mxu1 %v223_v42 }
 0x5b9   :  { %v620_v24 = vpop.permute.xlu0 %619 }
 0x5c1   :  { %v618_v26 = vpop.permute.xlu0 %617 }
 0x5c3   :  { %505 = vrot.lane.b32.xlu2 %v2734_v22, %s3286_s2  ;;  %s3327_s2 = smov 88  }
 0x5c9   :  { %v755_v33 = vpop.permute.xlu0 %754 }
 0x5ec   :  { %458 = vmax.xlane.f32.xlu2 %v457_v15 }
 0x604   :  { %756 = vrot.lane.b32.xlu2 %v2730_v20, %s3278_s8 }
 0x60c   :  { %784 = vrot.lane.b32.xlu2 %v2734_v22, %s3278_s8  ;;  %s3324_s8 = sld [smem:[#allocation12_spill]] }
 0x614   :  { %782 = vrot.lane.b32.xlu2 %v2734_v22, %s3280_s5  ;;  %s3334_s5 = smov 48  }
 0x61e   :  { %v474_v16 = vpop.xlane.xlu2 %473 }
 0x61f   :  { %2392 = vrcp.f32 %v474_v16 }
 0x625   :  { %v2393_v18 = vpop.eup %2392 }
 0x626   :  { %v478_v21 = vmul.f32 %v2393_v18, %v2391_v7  ;;  %v506_v23 = vpop.permute.xlu2 %505 }
 0x627   :  { %526 = vmatpush.msrb.mxu2 %v506_v23 }
 0x628   :  { %2241 = vmatmul.msk.f32.vlgmr.msrb.gmra.mxu2 %vm263_vm10, %v478_v21 }
 0x629   :  { %2246 = vmatpush.xpose.msk.msra.mxu2 %vm263_vm10, %v592_v19 }
 0x62d   :  { %2248 = vmatpush.xpose.msk.msrb.mxu2 %vm263_vm10, %v620_v24  ;;  %v225_v24 = vld [vmem:[%s3323_s9 + $0x10] sm:$0xff] }
 0x630   :  { %2247 = vmatmul.msk.f32.vlgmr.msra.gmra.mxu2 %vm263_vm10, %v590_v25 }
 0x638   :  { %2249 = vmatmul.msk.f32.vlgmr.msrb.gmra.mxu2 %vm263_vm10, %v618_v26 }
 0x65f   :  { %v459_v27 = vpop.xlane.xlu2 %458 }
 0x660   :  { %v463_v28 = vsub.f32 %v455_v14, %v459_v27 }
 0x662   :  { %v465_v30 = vmul.f32 1.442695, %v463_v28 }
 0x664   :  { %2394 = vpow2.f32 %v465_v30 }
 0x667   :  { %v757_v31 = vpop.permute.xlu2 %756 }
 0x668   :  { %2254 = vmatpush.xpose.msk.msra.mxu2 %vm263_vm10, %v757_v31 }
 0x66a   :  { %v2395_v32 = vpop.eup %2394 }
 0x66b   :  { %2255 = vmatmul.msk.f32.vlgmr.msra.gmra.mxu2 %vm263_vm10, %v755_v33  ;;  %v469_v34 = vsel %vm263_vm10, %v2395_v32, 0.0  ;;  %v226_v33 = vld [vmem:[%s3323_s9 + $0x18] sm:$0xff] }
 0x66c   :  { %470 = vadd.xlane.f32.xlu1 %v469_v34 }
 0x66f   :  { %v785_v61 = vpop.permute.xlu2 %784 }
 0x6ab   :  { %v528_v36 = vpop.f32.mrf.mxu2 }
 0x6b3   :  { %v614_v37 = vpop.f32.mrf.mxu2 }
 0x6b4   :  { %v645_v38 = vmul.f32 0.35355338, %v614_v37 }
 0x6b6   :  { %v647_v40 = vadd.f32 %v645_v38, %v2749_v29 }
 0x6b8   :  { %v649_v41 = vsel %vm263_vm10, %v647_v40, -inf }
 0x6b9   :  { %650 = vmax.xlane.f32.xlu1 %v649_v41 }
 0x6bb   :  { %v642_v45 = vpop.f32.mrf.mxu2 }
 0x6bc   :  { %v646_v50 = vmul.f32 0.35355338, %v642_v45 }
 0x6be   :  { %v648_v52 = vadd.f32 %v646_v50, %v2753_v35  ;;  %v2357_v50 = vld [vmem:[%s3324_s8] ss:$0 sm:$0xff] }
 0x6c0   :  { %v652_v53 = vsel %vm263_vm10, %v648_v52, -inf }
 0x6d2   :  { %671 = vrot.lane.b32.xlu1 %v2730_v20, %s3284_s29 }
 0x6df   :  { %v471_v43 = vpop.xlane.xlu1 %470 }
 0x6e0   :  { %2396 = vrcp.f32 %v471_v43 }
 0x6e6   :  { %v2397_v44 = vpop.eup %2396 }
 0x6e7   :  { %v477_v46 = vmul.f32 %v2397_v44, %v2395_v32 }
 0x6e9   :  { %2240 = vmatmul.msk.f32.vlgmr.msrb.gmra.mxu1 %vm263_vm10, %v477_v46 }
 0x6ea   :  { %744 = vmatpush.msrb.mxu1 %v225_v24 }
 0x6ee   :  { %v779_v47 = vpop.f32.mrf.mxu2 }
 0x6ef   :  { %v810_v48 = vmul.f32 0.35355338, %v779_v47 }
 0x6f1   :  { %2244 = vmatmul.msk.f32.vlgmr.msra.gmra.mxu1 %vm263_vm10, %v368_v10  ;;  %v812_v49 = vadd.f32 %v810_v48, %v2749_v29 }
 0x6f3   :  { %v814_v51 = vsel %vm263_vm10, %v812_v49, -inf }
 0x6f4   :  { %815 = vmax.xlane.f32.xlu2 %v814_v51 }
 0x6f9   :  { %2245 = vmatmul.msk.f32.gmra.mxu1 %vm263_vm10, %v2779_v63  ;;  %v783_v63 = vpop.permute.xlu2 %782 }
 0x6fc   :  { %653 = vmax.xlane.f32.xlu1 %v652_v53 }
 0x715   :  { %836 = vrot.lane.b32.xlu1 %v2730_v20, %s3282_s6 }
 0x72c   :  { %v651_v55 = vpop.xlane.xlu1 %650 }
 0x72d   :  { %v655_v56 = vsub.f32 %v647_v40, %v651_v55 }
 0x72f   :  { %v657_v57 = vmul.f32 1.442695, %v655_v56 }
 0x731   :  { %2398 = vpow2.f32 %v657_v57 }
 0x737   :  { %v2399_v58 = vpop.eup %2398 }
 0x738   :  { %v661_v59 = vsel %vm263_vm10, %v2399_v58, 0.0 }
 0x739   :  { %662 = vadd.xlane.f32.xlu0 %v661_v59 }
 0x744   :  { %v672_v60 = vpop.permute.xlu1 %671 }
 0x745   :  { %692 = vmatpush.msra.mxu3 %v672_v60 }
 0x766   :  { %v502_v62 = vpop.f32.mrf.mxu1 }
 0x767   :  { %2242 = vmatmul.msk.f32.vlgmr.msrb.gmra.mxu3 %vm263_vm10, %v502_v62  ;;  %v816_v20 = vpop.xlane.xlu2 %815 }
 0x768   :  { %2256 = vmatpush.xpose.msk.msrb.mxu3 %vm263_vm10, %v785_v61  ;;  %v820_v2 = vsub.f32 %v812_v49, %v816_v20  ;;  %v983_v20 = vld [vmem:[%s3255_s13 + $0x8] sm:$0xff] }
 0x76a   :  { %v822_v4 = vmul.f32 1.442695, %v820_v2 }
 0x76e   :  { %v583_v43 = vpop.f32.mrf.mxu1 }
 0x76f   :  { %2243 = vmatmul.msk.f32.gmra.mxu3 %vm263_vm10, %v528_v36  ;;  %v654_v0 = vpop.xlane.xlu1 %653 }
 0x770   :  { %v656_v1 = vsub.f32 %v648_v52, %v654_v0  ;;  %v982_v0 = vld [vmem:[%s3255_s13] sm:$0xff] }
 0x772   :  { %v659_v3 = vmul.f32 1.442695, %v656_v1 }
 0x774   :  { %2400 = vpow2.f32 %v659_v3 }
 0x775   :  { %2402 = vpow2.f32 %v822_v4 }
 0x776   :  { %v586_v44 = vpop.f32.mrf.mxu1 }
 0x77a   :  { %v2401_v5 = vpop.eup %2400 }
 0x77b   :  { %v664_v6 = vsel %vm263_vm10, %v2401_v5, 0.0  ;;  %v2403_v7 = vpop.eup %2402 }
 0x77c   :  { %665 = vadd.xlane.f32.xlu0 %v664_v6  ;;  %v826_v8 = vsel %vm263_vm10, %v2403_v7, 0.0 }
 0x784   :  { %827 = vadd.xlane.f32.xlu0 %v826_v8 }
 0x787   :  { %v837_v19 = vpop.permute.xlu1 %836 }
 0x798   :  { %697 = vrot.lane.b32.xlu0 %v2734_v22, %s3284_s29  ;;  %s3325_s29 = sld [smem:[#allocation13_spill]] }
 0x7ac   :  { %v663_v9 = vpop.xlane.xlu0 %662 }
 0x7ad   :  { %2404 = vrcp.f32 %v663_v9 }
 0x7b3   :  { %v2405_v10 = vpop.eup %2404 }
 0x7b4   :  { %v669_v11 = vmul.f32 %v2405_v10, %v2399_v58  ;;  %v2883_v10 = vld [vmem:[%s3325_s29] ss:$0 sm:$0xff] }
 0x7b6   :  { %2250 = vmatmul.msk.f32.vlgmr.msra.gmra.mxu3 %vm263_vm10, %v669_v11 }
 0x7b7   :  { %909 = vmatpush.msra.mxu3 %v226_v33  ;;  %v1039_v33 = vld [vmem:[%s3257_s15 + $0x10] sm:$0xff] }
 0x7be   :  { %2257 = vmatmul.msk.f32.vlgmr.msrb.gmra.mxu3 %vm263_vm10, %v783_v63  ;;  %v984_v63 = vld [vmem:[%s3255_s13 + $0x10] sm:$0xff] }
 0x7ea   :  { %v554_v25 = vpop.f32.mrf.mxu3 }
 0x7eb   :  { %v584_v46 = vadd.f32 %v583_v43, %v554_v25 }
 0x7ef   :  { %v666_v13 = vpop.xlane.xlu0 %665 }
 0x7f0   :  { %2406 = vrcp.f32 %v666_v13 }
 0x7f2   :  { %v2845_v26 = vpop.f32.mrf.mxu3 }
 0x7f6   :  { %v2407_v15 = vpop.eup %2406 }
 0x7f7   :  { %v828_v14 = vpop.xlane.xlu0 %827  ;;  %v670_v18 = vmul.f32 %v2407_v15, %v2401_v5 }
 0x7f8   :  { %2408 = vrcp.f32 %v828_v14 }
 0x7fe   :  { %v2409_v21 = vpop.eup %2408 }
 0x7ff   :  { %v834_v23 = vmul.f32 %v2409_v21, %v2403_v7 }
 0x80a   :  { %v698_v16 = vpop.permute.xlu0 %697 }
 0x80b   :  { %718 = vmatpush.msrb.mxu0 %v698_v16 }
 0x80c   :  { %2251 = vmatmul.msk.f32.vlgmr.msrb.gmra.mxu0 %vm263_vm10, %v670_v18 }
 0x80d   :  { %857 = vmatpush.msra.mxu0 %v837_v19  ;;  %v587_v19 = vadd.f32 %v586_v44, %v2845_v26  ;;  %v1042_v26 = vld [vmem:[%s3257_s15 + $0x28] sm:$0xff] }
 0x814   :  { %2258 = vmatmul.msk.f32.vlgmr.msra.gmra.mxu0 %vm263_vm10, %v834_v23 }
 0x839   :  { %v694_v27 = vpop.f32.mrf.mxu3 }
 0x83a   :  { %2252 = vmatmul.msk.f32.vlgmr.msrb.gmra.mxu1 %vm263_vm10, %v694_v27 }
 0x841   :  { %v807_v28 = vpop.f32.mrf.mxu3 }
 0x842   :  { %v811_v30 = vmul.f32 0.35355338, %v807_v28 }
 0x844   :  { %v813_v31 = vadd.f32 %v811_v30, %v2753_v35  ;;  %v1044_v30 = vld [vmem:[%s3257_s15 + $0x38] sm:$0xff] }
 0x845   :  { %1064 = vmatpush.msra.mxu1 %v1044_v30  ;;  %v2267_v30 = vld [vmem:[%s3318_s30 + $0x28] sm:$0xff] }
 0x846   :  { %v817_v32 = vsel %vm263_vm10, %v813_v31, -inf }
 0x847   :  { %818 = vmax.xlane.f32.xlu2 %v817_v32  ;;  %v1040_v32 = vld [vmem:[%s3257_s15 + $0x18] sm:$0xff] }
 0x85f   :  { %862 = vrot.lane.b32.xlu2 %v2734_v22, %s3282_s6  ;;  %s3326_s6 = sld [smem:[#allocation14_spill]] }
 0x865   :  { %v2888_v14 = vld [vmem:[%s3326_s6] ss:$0 sm:$0xff] }
 0x889   :  { %v720_v34 = vpop.f32.mrf.mxu0 }
 0x88a   :  { %2253 = vmatmul.msk.f32.gmra.mxu1 %vm263_vm10, %v720_v34  ;;  %v1038_v34 = vld [vmem:[%s3257_s15 + $0x8] sm:$0xff] }
 0x891   :  { %v859_v36 = vpop.f32.mrf.mxu0 }
 0x892   :  { %2260 = vmatmul.msk.f32.vlgmr.msra.gmra.mxu3 %vm263_vm10, %v859_v36  ;;  %v1037_v36 = vld [vmem:[%s3257_s15] sm:$0xff] }
 0x8b7   :  { %v746_v45 = vpop.f32.mrf.mxu1 }
 0x8b8   :  { %v752_v47 = vadd.f32 %v746_v45, %v584_v46 }
 0x8ba   :  { %v819_v37 = vpop.xlane.xlu2 %818 }
 0x8bb   :  { %v821_v38 = vsub.f32 %v813_v31, %v819_v37  ;;  %v1043_v31 = vld [vmem:[%s3257_s15 + $0x30] sm:$0xff]  ;;  %v2360_v37 = vld [vmem:[%s3254_s14] ss:$0 sm:$0xff] }
 0x8bc   :  { %1065 = vmatpush.msra.mxu1 %v1043_v31  ;;  %v2266_v31 = vld [vmem:[%s3318_s30 + $0x20] sm:$0xff] }
 0x8bd   :  { %v824_v40 = vmul.f32 1.442695, %v821_v38 }
 0x8be   :  { %1066 = vmatpush.msra.mxu1 %v1042_v26 }
 0x8bf   :  { %2410 = vpow2.f32 %v824_v40 }
 0x8c2   :  { %v863_v41 = vpop.permute.xlu2 %862 }
 0x8c3   :  { %883 = vmatpush.msrb.mxu2 %v863_v41 }
 0x8c5   :  { %v2411_v42 = vpop.eup %2410 }
 0x8c6   :  { %v829_v22 = vsel %vm263_vm10, %v2411_v42, 0.0 }
 0x8c7   :  { %830 = vadd.xlane.f32.xlu0 %v829_v22 }
 0x907   :  { %v749_v18 = vpop.f32.mrf.mxu1 }
 0x908   :  { %v753_v21 = vadd.f32 %v749_v18, %v587_v19 }
 0x915   :  { %v911_v48 = vpop.f32.mrf.mxu3 }
 0x916   :  { %v917_v49 = vadd.f32 %v911_v48, %v752_v47 }
 0x918   :  { %v919_v51 = vadd.f32 %v917_v49, %v2719_v12  ;;  %v985_v12 = vld [vmem:[%s3255_s13 + $0x18] sm:$0xff] }
 0x919   :  { %1008 = vmatpush.msrb.mxu0 %v985_v12 }
 0x91a   :  { %v924_v52 = vadd.f32 %v2357_v50, %v919_v51 }
 0x91b   :  { %1009 = vmatpush.msrb.mxu0 %v984_v63 }
 0x91c   :  { %v928_v53 = vsel %vm150_vm2, %v924_v52, 0.0 }
 0x91d   :  { %929 = vadd.xlane.f32.xlu1 %v928_v53  ;;  %1010 = vmatpush.msrb.mxu0 %v983_v20 }
 0x91f   :  { %1011 = vmatpush.msrb.mxu0 %v982_v0 }
 0x93a   :  { %v831_v54 = vpop.xlane.xlu0 %830 }
 0x93b   :  { %2412 = vrcp.f32 %v831_v54  ;;  %v2929_v54 = vld [vmem:[%s3256_s16] ss:$0 sm:$0xff] }
 0x941   :  { %v2413_v55 = vpop.eup %2412 }
 0x942   :  { %v835_v56 = vmul.f32 %v2413_v55, %v2411_v42 }
 0x944   :  { %2259 = vmatmul.msk.f32.vlgmr.msrb.gmra.mxu2 %vm263_vm10, %v835_v56 }
 0x990   :  { %v930_v57 = vpop.xlane.xlu1 %929 }
 0x991   :  { %v934_v58 = vmul.f32 %v930_v57, %v2693_v39 }
 0x993   :  { %v936_v59 = vsub.f32 %v924_v52, %v934_v58 }
 0x995   :  { %v938_v60 = vmul.f32 %v936_v59, %v936_v59 }
 0x997   :  { %v940_v61 = vsel %vm150_vm2, %v938_v60, 0.0 }
 0x998   :  { %941 = vadd.xlane.f32.xlu2 %v940_v61 }
 0x9c7   :  { %v885_v62 = vpop.f32.mrf.mxu2 }
 0x9c8   :  { %2261 = vmatmul.msk.f32.gmra.mxu3 %vm263_vm10, %v885_v62 }
 0xa0b   :  { %v942_v1 = vpop.xlane.xlu2 %941 }
 0xa0c   :  { %v946_v2 = vmul.f32 %v942_v1, %v2693_v39 }
 0xa0e   :  { %v948_v3 = vadd.f32 1e-12, %v946_v2 }
 0xa10   :  { %2414 = vrsqrt.f32 %v948_v3  ;;  %vm956_vm12 = vweird.f32 %v948_v3 }
 0xa16   :  { %v2415_v4 = vpop.eup %2414 }
 0xa17   :  { %v951_v5 = vmul.f32 %v2415_v4, %v948_v3  ;;  %vm957_vm11 = vweird.f32 %v2415_v4 }
 0xa18   :  { %vm958_vm13 = vmor %vm956_vm12, %vm957_vm11 }
 0xa19   :  { %v952_v6 = vmul.f32 %v2415_v4, %v951_v5 }
 0xa1b   :  { %v953_v7 = vmul.f32 0.5, %v952_v6 }
 0xa1d   :  { %v954_v8 = vsub.f32 1.5, %v953_v7 }
 0xa1f   :  { %v955_v9 = vmul.f32 %v2415_v4, %v954_v8 }
 0xa21   :  { %v959_v11 = vsel %vm958_vm13, %v2415_v4, %v955_v9 }
 0xa22   :  { %v970_v13 = vmul.f32 %v959_v11, %v936_v59 }
 0xa24   :  { %v975_v15 = vmul.f32 %v2883_v10, %v970_v13 }
 0xa26   :  { %v980_v16 = vadd.f32 %v2888_v14, %v975_v15 }
 0xa28   :  { %2262 = vmatmul.msk.f32.vlgmr.msrb.gmra.mxu0 %vm150_vm2, %v980_v16 }
 0xa4b   :  { %v914_v23 = vpop.f32.mrf.mxu3 }
 0xa4c   :  { %v918_v24 = vadd.f32 %v914_v23, %v753_v21 }
 0xa4e   :  { %v920_v25 = vadd.f32 %v918_v24, %v2723_v17  ;;  %v1041_v17 = vld [vmem:[%s3257_s15 + $0x20] sm:$0xff] }
 0xa4f   :  { %1067 = vmatpush.msra.mxu1 %v1041_v17 }
 0xa50   :  { %v925_v27 = vadd.f32 %v2357_v50, %v920_v25 }
 0xa51   :  { %1068 = vmatpush.msra.mxu1 %v1040_v32 }
 0xa52   :  { %v931_v28 = vsel %vm150_vm2, %v925_v27, 0.0 }
 0xa53   :  { %932 = vadd.xlane.f32.xlu0 %v931_v28  ;;  %1069 = vmatpush.msra.mxu1 %v1039_v33  ;;  %v2268_v28 = vld [vmem:[%s3318_s30 + $0x30] sm:$0xff] }
 0xa55   :  { %1070 = vmatpush.msra.mxu1 %v1038_v34 }
 0xa57   :  { %1071 = vmatpush.msra.mxu1 %v1037_v36 }
 0xaa5   :  { %v1013_v38 = vpop.f32.mrf.mxu0 }
 0xaa6   :  { %v1014_v40 = vadd.f32 %v2360_v37, %v1013_v38 }
 0xaa8   :  { %v1021_v41 = vmul.f32 0.044715, %v1014_v40  ;;  %v1019_v46 = vmul.f32 0.5, %v1014_v40 }
 0xaaa   :  { %v1023_v42 = vmul.f32 %v1021_v41, %v1014_v40  ;;  %v2362_v41 = vld [vmem:[%s3258_s17] ss:$0 sm:$0xff] }
 0xaac   :  { %v1025_v22 = vmul.f32 %v1023_v42, %v1014_v40 }
 0xaae   :  { %v1027_v43 = vadd.f32 %v1025_v22, %v1014_v40 }
 0xab0   :  { %v1029_v44 = vmul.f32 0.7978846, %v1027_v43  ;;  %v2363_v43 = vld [vmem:[%s3259_s18] ss:$0 sm:$0xff] }
 0xab2   :  { %2416 = vtanh.f32 %v1029_v44 }
 0xab8   :  { %v2417_v45 = vpop.eup %2416 }
 0xab9   :  { %v1033_v47 = vadd.f32 1.0, %v2417_v45 }
 0xabb   :  { %v1035_v48 = vmul.f32 %v1033_v47, %v1019_v46 }
 0xabd   :  { %2264 = vmatmul.msk.f32.vlgmr.msra.gmra.mxu1 %vm1049_vm14, %v1035_v48 }
 0xac6   :  { %v933_v49 = vpop.xlane.xlu0 %932 }
 0xac7   :  { %v935_v50 = vmul.f32 %v933_v49, %v2693_v39 }
 0xac9   :  { %v937_v51 = vsub.f32 %v925_v27, %v935_v50  ;;  %v2269_v27 = vld [vmem:[%s3318_s30 + $0x38] sm:$0xff]  ;;  %v2364_v50 = vld [vmem:[%s3321_s3 + $0x1] ss:$0 sm:$0xff]  ;;  %s3330_s3 = smov 64  }
 0xaca   :  { %1172 = vmatpush.msra.mxu2 %v2269_v27 }
 0xacb   :  { %v939_v52 = vmul.f32 %v937_v51, %v937_v51 }
 0xacc   :  { %1173 = vmatpush.msra.mxu2 %v2268_v28 }
 0xacd   :  { %v943_v53 = vsel %vm150_vm2, %v939_v52, 0.0 }
 0xace   :  { %944 = vadd.xlane.f32.xlu0 %v943_v53  ;;  %1174 = vmatpush.msra.mxu2 %v2267_v30 }
 0xad0   :  { %1175 = vmatpush.msra.mxu2 %v2266_v31 }
 0xb3a   :  { %v1073_v55 = vpop.f32.mrf.mxu1 }
 0xb3b   :  { %v1074_v56 = vadd.f32 %v2929_v54, %v1073_v55 }
 0xb3d   :  { %v1079_v57 = vadd.f32 %v1074_v56, %v980_v16 }
 0xb3f   :  { %v1083_v58 = vsel %vm150_vm2, %v1079_v57, 0.0 }
 0xb40   :  { %1084 = vadd.xlane.f32.xlu0 %v1083_v58 }
 0xb41   :  { %v945_v59 = vpop.xlane.xlu0 %944 }
 0xb42   :  { %v947_v60 = vmul.f32 %v945_v59, %v2693_v39 }
 0xb44   :  { %v949_v61 = vadd.f32 1e-12, %v947_v60 }
 0xb46   :  { %2418 = vrsqrt.f32 %v949_v61  ;;  %vm966_vm0 = vweird.f32 %v949_v61 }
 0xb4c   :  { %v2419_v62 = vpop.eup %2418 }
 0xb4d   :  { %v961_v12 = vmul.f32 %v2419_v62, %v949_v61  ;;  %vm967_vm15 = vweird.f32 %v2419_v62 }
 0xb4e   :  { %vm968_vm1 = vmor %vm966_vm0, %vm967_vm15 }
 0xb4f   :  { %v962_v63 = vmul.f32 %v2419_v62, %v961_v12 }
 0xb51   :  { %v963_v20 = vmul.f32 0.5, %v962_v63 }
 0xb53   :  { %v964_v0 = vsub.f32 1.5, %v963_v20 }
 0xb55   :  { %v965_v1 = vmul.f32 %v2419_v62, %v964_v0 }
 0xb57   :  { %v969_v2 = vsel %vm968_vm1, %v2419_v62, %v965_v1 }
 0xb58   :  { %v971_v3 = vmul.f32 %v969_v2, %v937_v51 }
 0xb5a   :  { %v976_v4 = vmul.f32 %v2883_v10, %v971_v3 }
 0xb5c   :  { %v981_v5 = vadd.f32 %v2888_v14, %v976_v4 }
 0xb5e   :  { %2263 = vmatmul.msk.f32.gmra.mxu0 %vm150_vm2, %v981_v5 }
 0xbb3   :  { %v1085_v6 = vpop.xlane.xlu0 %1084 }
 0xbb4   :  { %v1089_v7 = vmul.f32 %v1085_v6, %v2693_v39 }
 0xbb6   :  { %v1091_v8 = vsub.f32 %v1079_v57, %v1089_v7 }
 0xbb8   :  { %v1093_v9 = vmul.f32 %v1091_v8, %v1091_v8 }
 0xbba   :  { %v1095_v11 = vsel %vm150_vm2, %v1093_v9, 0.0 }
 0xbbb   :  { %1096 = vadd.xlane.f32.xlu1 %v1095_v11 }
 0xbdb   :  { %v1016_v13 = vpop.f32.mrf.mxu0 }
 0xbdc   :  { %v1017_v15 = vadd.f32 %v2360_v37, %v1016_v13 }
 0xbde   :  { %v1022_v16 = vmul.f32 0.044715, %v1017_v15  ;;  %v1020_v14 = vmul.f32 0.5, %v1017_v15 }
 0xbe0   :  { %v1024_v18 = vmul.f32 %v1022_v16, %v1017_v15 }
 0xbe2   :  { %v1026_v19 = vmul.f32 %v1024_v18, %v1017_v15 }
 0xbe4   :  { %v1028_v21 = vadd.f32 %v1026_v19, %v1017_v15 }
 0xbe6   :  { %v1030_v23 = vmul.f32 0.7978846, %v1028_v21 }
 0xbe8   :  { %2420 = vtanh.f32 %v1030_v23 }
 0xbee   :  { %v2421_v10 = vpop.eup %2420 }
 0xbef   :  { %v1034_v24 = vadd.f32 1.0, %v2421_v10 }
 0xbf1   :  { %v1036_v25 = vmul.f32 %v1034_v24, %v1020_v14 }
 0xbf3   :  { %2265 = vmatmul.msk.f32.gmra.mxu1 %vm1049_vm14, %v1036_v25 }
 0xc2e   :  { %v1097_v26 = vpop.xlane.xlu1 %1096 }
 0xc2f   :  { %v1101_v17 = vmul.f32 %v1097_v26, %v2693_v39 }
 0xc31   :  { %v1103_v32 = vadd.f32 1e-12, %v1101_v17 }
 0xc33   :  { %2422 = vrsqrt.f32 %v1103_v32  ;;  %vm1111_vm4 = vweird.f32 %v1103_v32 }
 0xc39   :  { %v2423_v33 = vpop.eup %2422 }
 0xc3a   :  { %v1106_v34 = vmul.f32 %v2423_v33, %v1103_v32  ;;  %vm1112_vm3 = vweird.f32 %v2423_v33 }
 0xc3b   :  { %vm1113_vm5 = vmor %vm1111_vm4, %vm1112_vm3 }
 0xc3c   :  { %v1107_v36 = vmul.f32 %v2423_v33, %v1106_v34 }
 0xc3e   :  { %v1108_v37 = vmul.f32 0.5, %v1107_v36 }
 0xc40   :  { %v1109_v38 = vsub.f32 1.5, %v1108_v37 }
 0xc42   :  { %v1110_v40 = vmul.f32 %v2423_v33, %v1109_v38 }
 0xc44   :  { %v1114_v42 = vsel %vm1113_vm5, %v2423_v33, %v1110_v40 }
 0xc45   :  { %v1125_v22 = vmul.f32 %v1114_v42, %v1091_v8 }
 0xc47   :  { %v1130_v44 = vmul.f32 %v2362_v41, %v1125_v22 }
 0xc49   :  { %v2959_v45 = vadd.f32 %v2363_v43, %v1130_v44 }
 0xc4b   :  { %2276 = vmatmul.msk.f32.vlgmr.msra.gmra.mxu2 %vm150_vm2, %v2959_v45 }
 0xc70   :  { %v1076_v46 = vpop.f32.mrf.mxu1 }
 0xc71   :  { %v1077_v47 = vadd.f32 %v2929_v54, %v1076_v46 }
 0xc73   :  { %v1080_v48 = vadd.f32 %v1077_v47, %v981_v5 }
 0xc75   :  { %v1086_v49 = vsel %vm150_vm2, %v1080_v48, 0.0 }
 0xc76   :  { %1087 = vadd.xlane.f32.xlu0 %v1086_v49 }
 0xcce   :  { %v1177_v51 = vpop.f32.mrf.mxu2 }
 0xccf   :  { %v2968_v52 = vadd.f32 %v2364_v50, %v1177_v51  ;;  %v2271_v51 = vld [vmem:[%s3323_s9 + $0x20] sm:$0xff] }
 0xcd1   :  { %1317 = vrot.lane.b32.xlu0 %v2968_v52, %s3327_s2  ;;  %1184 = vrot.lane.b32.xlu2 %v2968_v52, %s3328_s7 }
 0xce9   :  { %v1088_v53 = vpop.xlane.xlu0 %1087 }
 0xcea   :  { %v1090_v54 = vmul.f32 %v1088_v53, %v2693_v39 }
 0xcec   :  { %v1092_v55 = vsub.f32 %v1080_v48, %v1090_v54 }
 0xcee   :  { %v1094_v56 = vmul.f32 %v1092_v55, %v1092_v55 }
 0xcf0   :  { %v1098_v57 = vsel %vm150_vm2, %v1094_v56, 0.0 }
 0xcf1   :  { %1099 = vadd.xlane.f32.xlu1 %v1098_v57 }
 0xd0a   :  { %1315 = vrot.lane.b32.xlu1 %v2968_v52, %s3329_s1 }
 0xd2b   :  { %v1185_v58 = vpop.permute.xlu2 %1184 }
 0xd2c   :  { %2278 = vmatpush.xpose.msk.msrb.mxu3 %vm263_vm10, %v1185_v58 }
 0xd2f   :  { %2279 = vmatmul.msk.f32.vlgmr.msrb.gmra.mxu3 %vm263_vm10, %v2968_v52 }
 0xd43   :  { %v1318_v59 = vpop.permute.xlu0 %1317 }
 0xd44   :  { %2284 = vmatpush.xpose.msk.msra.mxu3 %vm263_vm10, %v1318_v59 }
 0xd64   :  { %v1100_v60 = vpop.xlane.xlu1 %1099 }
 0xd65   :  { %v1102_v61 = vmul.f32 %v1100_v60, %v2693_v39 }
 0xd67   :  { %v1104_v62 = vadd.f32 1e-12, %v1102_v61 }
 0xd69   :  { %2424 = vrsqrt.f32 %v1104_v62  ;;  %vm1121_vm7 = vweird.f32 %v1104_v62 }
 0xd6f   :  { %v2425_v12 = vpop.eup %2424 }
 0xd70   :  { %v1116_v63 = vmul.f32 %v2425_v12, %v1104_v62  ;;  %vm1122_vm6 = vweird.f32 %v2425_v12 }
 0xd71   :  { %vm1123_vm8 = vmor %vm1121_vm7, %vm1122_vm6  ;;  %vm2073_vm7 = vcmask 1041409  }
 0xd72   :  { %v1117_v20 = vmul.f32 %v2425_v12, %v1116_v63 }
 0xd74   :  { %v1118_v0 = vmul.f32 0.5, %v1117_v20 }
 0xd76   :  { %v1119_v1 = vsub.f32 1.5, %v1118_v0  ;;  %v2272_v0 = vld [vmem:[%s3323_s9 + $0x28] sm:$0xff] }
 0xd77   :  { %1470 = vmatpush.msrb.mxu3 %v2272_v0 }
 0xd78   :  { %v1120_v2 = vmul.f32 %v2425_v12, %v1119_v1 }
 0xd7a   :  { %v1124_v3 = vsel %vm1123_vm8, %v2425_v12, %v1120_v2  ;;  %vm2104_vm8 = vcmask 15360  }
 0xd7b   :  { %v1126_v4 = vmul.f32 %v1124_v3, %v1092_v55 }
 0xd7c   :  { %v1316_v5 = vpop.permute.xlu1 %1315 }
 0xd7d   :  { %2285 = vmatmul.msk.f32.vlgmr.msra.gmra.mxu3 %vm263_vm10, %v1316_v5  ;;  %v1131_v6 = vmul.f32 %v2362_v41, %v1126_v4 }
 0xd7f   :  { %v2984_v7 = vadd.f32 %v2363_v43, %v1131_v6 }
 0xd81   :  { %2277 = vmatmul.msk.f32.gmra.mxu2 %vm150_vm2, %v2984_v7 }
 0xdb2   :  { %v1207_v8 = vpop.f32.mrf.mxu3 }
 0xdb3   :  { %v1237_v9 = vmul.f32 0.35355338, %v1207_v8 }
 0xdb5   :  { %v1239_v11 = vadd.f32 %v1237_v9, %v2749_v29 }
 0xdb7   :  { %v1241_v13 = vsel %vm263_vm10, %v1239_v11, -inf }
 0xdb8   :  { %1242 = vmax.xlane.f32.xlu0 %v1241_v13 }
 0xe00   :  { %v1340_v18 = vpop.f32.mrf.mxu3 }
 0xe01   :  { %v1371_v19 = vmul.f32 0.35355338, %v1340_v18 }
 0xe03   :  { %v1373_v23 = vadd.f32 %v1371_v19, %v2749_v29 }
 0xe04   :  { %v1180_v15 = vpop.f32.mrf.mxu2 }
 0xe05   :  { %v2990_v16 = vadd.f32 %v2364_v50, %v1180_v15  ;;  %v1375_v24 = vsel %vm263_vm10, %v1373_v23, -inf }
 0xe07   :  { %1345 = vrot.lane.b32.xlu1 %v2990_v16, %s3327_s2  ;;  %1211 = vrot.lane.b32.xlu2 %v2990_v16, %s3328_s7  ;;  %s3336_s7 = smov 72  }
 0xe0f   :  { %1343 = vrot.lane.b32.xlu1 %v2990_v16, %s3329_s1  ;;  %s3337_s1 = smov 40  }
 0xe2b   :  { %v1243_v21 = vpop.xlane.xlu0 %1242 }
 0xe2c   :  { %v1247_v10 = vsub.f32 %v1239_v11, %v1243_v21 }
 0xe2e   :  { %v1249_v14 = vmul.f32 1.442695, %v1247_v10 }
 0xe30   :  { %2426 = vpow2.f32 %v1249_v14  ;;  %1376 = vmax.xlane.f32.xlu2 %v1375_v24 }
 0xe36   :  { %v2427_v25 = vpop.eup %2426 }
 0xe37   :  { %v1253_v27 = vsel %vm263_vm10, %v2427_v25, 0.0 }
 0xe39   :  { %1254 = vadd.xlane.f32.xlu1 %v1253_v27 }
 0xe48   :  { %1263 = vrot.lane.b32.xlu2 %v2968_v52, %s3330_s3 }
 0xe50   :  { %1507 = vrot.lane.b32.xlu2 %v2968_v52, %s3331_s10 }
 0xe52   :  { %1509 = vrot.lane.b32.xlu1 %v2968_v52, %s3332_s28 }
 0xe5a   :  { %1289 = vrot.lane.b32.xlu1 %v2990_v16, %s3330_s3 }
 0xe61   :  { %v1212_v28 = vpop.permute.xlu2 %1211 }
 0xe62   :  { %2280 = vmatpush.xpose.msk.msra.mxu0 %vm263_vm10, %v1212_v28 }
 0xe65   :  { %2281 = vmatmul.msk.f32.vlgmr.msra.gmra.mxu0 %vm263_vm10, %v2990_v16 }
 0xe79   :  { %v1346_v30 = vpop.permute.xlu1 %1345 }
 0xe7a   :  { %2286 = vmatpush.xpose.msk.msrb.mxu0 %vm263_vm10, %v1346_v30 }
 0xe7e   :  { %1499 = vmatpush.msra.mxu0 %v2271_v51  ;;  %v2273_v51 = vld [vmem:[%s3323_s9 + $0x30] sm:$0xff] }
 0xe7f   :  { %1662 = vmatpush.msra.mxu3 %v2273_v51 }
 0xe81   :  { %v1344_v31 = vpop.permute.xlu1 %1343 }
 0xe82   :  { %2287 = vmatmul.msk.f32.vlgmr.msrb.gmra.mxu0 %vm263_vm10, %v1344_v31 }
 0xea3   :  { %v1377_v26 = vpop.xlane.xlu2 %1376 }
 0xea4   :  { %v1381_v17 = vsub.f32 %v1373_v23, %v1377_v26 }
 0xea6   :  { %v1383_v32 = vmul.f32 1.442695, %v1381_v17 }
 0xea8   :  { %2428 = vpow2.f32 %v1383_v32 }
 0xeab   :  { %v1264_v33 = vpop.permute.xlu2 %1263 }
 0xeac   :  { %1284 = vmatpush.msrb.mxu1 %v1264_v33  ;;  %v1255_v34 = vpop.xlane.xlu1 %1254 }
 0xead   :  { %2430 = vrcp.f32 %v1255_v34 }
 0xeae   :  { %v2429_v36 = vpop.eup %2428 }
 0xeaf   :  { %v1387_v37 = vsel %vm263_vm10, %v2429_v36, 0.0 }
 0xeb0   :  { %1388 = vadd.xlane.f32.xlu0 %v1387_v37 }
 0xeb3   :  { %v2431_v38 = vpop.eup %2430  ;;  %v1508_v58 = vpop.permute.xlu2 %1507 }
 0xeb4   :  { %v1261_v40 = vmul.f32 %v2431_v38, %v2427_v25 }
 0xeb6   :  { %2282 = vmatmul.msk.f32.vlgmr.msrb.gmra.mxu1 %vm263_vm10, %v1261_v40 }
 0xec4   :  { %1397 = vrot.lane.b32.xlu0 %v2968_v52, %s3333_s0  ;;  %v1510_v41 = vpop.permute.xlu1 %1509 }
 0xecc   :  { %v1290_v42 = vpop.permute.xlu1 %1289 }
 0xecd   :  { %1310 = vmatpush.msrb.mxu2 %v1290_v42 }
 0xee2   :  { %v1234_v22 = vpop.f32.mrf.mxu0 }
 0xee3   :  { %v1238_v43 = vmul.f32 0.35355338, %v1234_v22 }
 0xee5   :  { %v1240_v44 = vadd.f32 %v1238_v43, %v2753_v35 }
 0xee7   :  { %v1244_v46 = vsel %vm263_vm10, %v1240_v44, -inf }
 0xeee   :  { %1245 = vmax.xlane.f32.xlu0 %v1244_v46 }
 0xeff   :  { %v1368_v47 = vpop.f32.mrf.mxu0 }
 0xf00   :  { %v1372_v48 = vmul.f32 0.35355338, %v1368_v47 }
 0xf02   :  { %v1374_v49 = vadd.f32 %v1372_v48, %v2753_v35 }
 0xf04   :  { %v1378_v50 = vsel %vm263_vm10, %v1374_v49, -inf }
 0xf05   :  { %1379 = vmax.xlane.f32.xlu1 %v1378_v50 }
 0xf1e   :  { %1535 = vrot.lane.b32.xlu1 %v2990_v16, %s3331_s10 }
 0xf23   :  { %v1389_v53 = vpop.xlane.xlu0 %1388 }
 0xf24   :  { %2432 = vrcp.f32 %v1389_v53 }
 0xf26   :  { %1589 = vrot.lane.b32.xlu1 %v2968_v52, %s3334_s5 }
 0xf2a   :  { %v2433_v54 = vpop.eup %2432 }
 0xf2b   :  { %v1395_v56 = vmul.f32 %v2433_v54, %v2429_v36 }
 0xf2e   :  { %1700 = vrot.lane.b32.xlu1 %v2990_v16, %s3335_s11 }
 0xf33   :  { %v1286_v55 = vpop.f32.mrf.mxu1 }
 0xf34   :  { %2292 = vmatmul.msk.f32.vlgmr.msra.gmra.mxu0 %vm263_vm10, %v1286_v55 }
 0xf36   :  { %v1398_v57 = vpop.permute.xlu0 %1397 }
 0xf37   :  { %1418 = vmatpush.msra.mxu1 %v1398_v57 }
 0xf38   :  { %2288 = vmatmul.msk.f32.vlgmr.msra.gmra.mxu1 %vm263_vm10, %v1395_v56 }
 0xf39   :  { %2294 = vmatpush.xpose.msk.msrb.mxu1 %vm263_vm10, %v1510_v41 }
 0xf40   :  { %2295 = vmatmul.msk.f32.vlgmr.msrb.gmra.mxu1 %vm263_vm10, %v1508_v58 }
 0xf61   :  { %v1246_v59 = vpop.xlane.xlu0 %1245 }
 0xf62   :  { %v1248_v60 = vsub.f32 %v1240_v44, %v1246_v59 }
 0xf64   :  { %v1251_v61 = vmul.f32 1.442695, %v1248_v60 }
 0xf66   :  { %2434 = vpow2.f32 %v1251_v61 }
 0xf6c   :  { %v2435_v62 = vpop.eup %2434 }
 0xf6d   :  { %v1256_v12 = vsel %vm263_vm10, %v2435_v62, 0.0 }
 0xf6e   :  { %1257 = vadd.xlane.f32.xlu2 %v1256_v12 }
 0xf78   :  { %v1380_v63 = vpop.xlane.xlu1 %1379 }
 0xf79   :  { %v1382_v2 = vsub.f32 %v1374_v49, %v1380_v63 }
 0xf7b   :  { %v1385_v3 = vmul.f32 1.442695, %v1382_v2 }
 0xf7d   :  { %2436 = vpow2.f32 %v1385_v3 }
 0xf83   :  { %v2437_v4 = vpop.eup %2436 }
 0xf84   :  { %v1390_v5 = vsel %vm263_vm10, %v2437_v4, 0.0 }
 0xf86   :  { %1537 = vrot.lane.b32.xlu2 %v2990_v16, %s3332_s28 }
 0xf90   :  { %v1536_v20 = vpop.permute.xlu1 %1535 }
 0xf98   :  { %v1590_v1 = vpop.permute.xlu1 %1589 }
 0xf99   :  { %1610 = vmatpush.msra.mxu1 %v1590_v1 }
 0xfa0   :  { %v1701_v38 = vpop.permute.xlu1 %1700 }
 0xfaf   :  { %1391 = vadd.xlane.f32.xlu2 %v1390_v5 }
 0xfb1   :  { %v3067_v44 = vpop.f32.mrf.mxu0 }
 0xfb5   :  { %v1420_v6 = vpop.f32.mrf.mxu1 }
 0xfb6   :  { %2290 = vmatmul.msk.f32.vlgmr.msrb.gmra.mxu3 %vm263_vm10, %v1420_v6 }
 0xfbd   :  { %v1532_v8 = vpop.f32.mrf.mxu1 }
 0xfbe   :  { %v1563_v9 = vmul.f32 0.35355338, %v1532_v8 }
 0xfc0   :  { %v1565_v11 = vadd.f32 %v1563_v9, %v2749_v29 }
 0xfc2   :  { %v1567_v13 = vsel %vm263_vm10, %v1565_v11, -inf }
 0xfc3   :  { %1568 = vmax.xlane.f32.xlu0 %v1567_v13 }
 0xfc7   :  { %1674 = vrot.lane.b32.xlu2 %v2968_v52, %s3336_s7 }
 0xfcf   :  { %1672 = vrot.lane.b32.xlu2 %v2968_v52, %s3335_s11 }
 0xfd7   :  { %1423 = vrot.lane.b32.xlu0 %v2990_v16, %s3333_s0  ;;  %1702 = vrot.lane.b32.xlu2 %v2990_v16, %s3336_s7 }
 0xfe1   :  { %v1258_v15 = vpop.xlane.xlu2 %1257 }
 0xfe2   :  { %2438 = vrcp.f32 %v1258_v15 }
 0xfe8   :  { %v2439_v18 = vpop.eup %2438 }
 0xfe9   :  { %v1262_v19 = vmul.f32 %v2439_v18, %v2435_v62  ;;  %v1538_v21 = vpop.permute.xlu2 %1537 }
 0xfeb   :  { %2283 = vmatmul.msk.f32.vlgmr.msrb.gmra.mxu2 %vm263_vm10, %v1262_v19 }
0x1022   :  { %v1392_v23 = vpop.xlane.xlu2 %1391 }
0x102a   :  { %v1675_v10 = vpop.permute.xlu2 %1674 }
0x102b   :  { %2302 = vmatpush.xpose.msk.msrb.mxu0 %vm263_vm10, %v1675_v10 }
0x1032   :  { %v1673_v14 = vpop.permute.xlu2 %1672 }
0x1036   :  { %v1569_v24 = vpop.xlane.xlu0 %1568 }
0x1037   :  { %v1573_v25 = vsub.f32 %v1565_v11, %v1569_v24 }
0x1039   :  { %v1575_v27 = vmul.f32 1.442695, %v1573_v25  ;;  %v1472_v25 = vpop.f32.mrf.mxu3 }
0x103a   :  { %v1703_v28 = vpop.permute.xlu2 %1702 }
0x103b   :  { %2440 = vpow2.f32 %v1575_v27  ;;  %2304 = vmatpush.xpose.msk.msrb.mxu1 %vm263_vm10, %v1703_v28 }
0x103c   :  { %2442 = vrcp.f32 %v1392_v23  ;;  %v2274_v23 = vld [vmem:[%s3323_s9 + $0x38] sm:$0xff] }
0x1041   :  { %v2441_v30 = vpop.eup %2440 }
0x1042   :  { %v1579_v31 = vsel %vm263_vm10, %v2441_v30, 0.0  ;;  %v2443_v26 = vpop.eup %2442 }
0x1043   :  { %1580 = vadd.xlane.f32.xlu0 %v1579_v31  ;;  %v1396_v17 = vmul.f32 %v2443_v26, %v2437_v4 }
0x1049   :  { %v1424_v32 = vpop.permute.xlu0 %1423 }
0x104a   :  { %1444 = vmatpush.msra.mxu2 %v1424_v32  ;;  %v2365_v32 = vld [vmem:[%s3324_s8 + $0x1] ss:$0 sm:$0xff] }
0x104b   :  { %2289 = vmatmul.msk.f32.vlgmr.msra.gmra.mxu2 %vm263_vm10, %v1396_v17 }
0x104c   :  { %2296 = vmatpush.xpose.msk.msrb.mxu2 %vm263_vm10, %v1538_v21 }
0x1053   :  { %2297 = vmatmul.msk.f32.vlgmr.msrb.gmra.mxu2 %vm263_vm10, %v1536_v20 }
0x106e   :  { %v1312_v33 = vpop.f32.mrf.mxu2 }
0x106f   :  { %2293 = vmatmul.msk.f32.gmra.mxu0 %vm263_vm10, %v1312_v33 }
0x1077   :  { %2303 = vmatmul.msk.f32.vlgmr.msrb.gmra.mxu0 %vm263_vm10, %v1673_v14 }
0x10b6   :  { %v1581_v34 = vpop.xlane.xlu0 %1580 }
0x10b7   :  { %2444 = vrcp.f32 %v1581_v34 }
0x10bd   :  { %v2445_v36 = vpop.eup %2444 }
0x10be   :  { %v1587_v37 = vmul.f32 %v2445_v36, %v2441_v30  ;;  %v1502_v30 = vadd.f32 %v3067_v44, %v1472_v25  ;;  %v2324_v25 = vld [vmem:[%s3257_s15 + $0x68] sm:$0xff] }
0x10c0   :  { %2298 = vmatmul.msk.f32.vlgmr.msra.gmra.mxu1 %vm263_vm10, %v1587_v37 }
0x10c1   :  { %1827 = vmatpush.msra.mxu1 %v2274_v23 }
0x10c8   :  { %2305 = vmatmul.msk.f32.vlgmr.msrb.gmra.mxu1 %vm263_vm10, %v1701_v38 }
0x10ce   :  { %v1446_v40 = vpop.f32.mrf.mxu2 }
0x10cf   :  { %2291 = vmatmul.msk.f32.gmra.mxu3 %vm263_vm10, %v1446_v40 }
0x10d6   :  { %v1560_v41 = vpop.f32.mrf.mxu2 }
0x10d7   :  { %v1564_v42 = vmul.f32 0.35355338, %v1560_v41 }
0x10d9   :  { %v1566_v22 = vadd.f32 %v1564_v42, %v2753_v35 }
0x10db   :  { %v1570_v43 = vsel %vm263_vm10, %v1566_v22, -inf }
0x10dc   :  { %1571 = vmax.xlane.f32.xlu2 %v1570_v43 }
0x10ec   :  { %v3069_v46 = vpop.f32.mrf.mxu0 }
0x10f4   :  { %v1697_v47 = vpop.f32.mrf.mxu0  ;;  %1754 = vrot.lane.b32.xlu2 %v2968_v52, %s3337_s1 }
0x10f5   :  { %v1728_v48 = vmul.f32 0.35355338, %v1697_v47 }
0x10f7   :  { %v1730_v49 = vadd.f32 %v1728_v48, %v2749_v29 }
0x10f9   :  { %v1732_v50 = vsel %vm263_vm10, %v1730_v49, -inf }
0x10fa   :  { %1733 = vmax.xlane.f32.xlu1 %v1732_v50 }
0x113d   :  { %v1612_v53 = vpop.f32.mrf.mxu1 }
0x113e   :  { %2300 = vmatmul.msk.f32.vlgmr.msra.gmra.mxu3 %vm263_vm10, %v1612_v53 }
0x1145   :  { %v1725_v54 = vpop.f32.mrf.mxu1 }
0x1146   :  { %v1729_v55 = vmul.f32 0.35355338, %v1725_v54 }
0x1148   :  { %v1731_v56 = vadd.f32 %v1729_v55, %v2753_v35 }
0x114a   :  { %v1735_v52 = vsel %vm263_vm10, %v1731_v56, -inf }
0x114b   :  { %1736 = vmax.xlane.f32.xlu0 %v1735_v52  ;;  %v2313_v52 = vld [vmem:[%s3255_s13 + $0x28] sm:$0xff] }
0x114f   :  { %v1572_v29 = vpop.xlane.xlu2 %1571 }
0x1150   :  { %v1574_v57 = vsub.f32 %v1566_v22, %v1572_v29  ;;  %v2312_v29 = vld [vmem:[%s3255_s13 + $0x20] sm:$0xff] }
0x1152   :  { %v1577_v58 = vmul.f32 1.442695, %v1574_v57  ;;  %v1475_v27 = vpop.f32.mrf.mxu3 }
0x1153   :  { %v1505_v38 = vadd.f32 %v3069_v46, %v1475_v27  ;;  %v2323_v27 = vld [vmem:[%s3257_s15 + $0x60] sm:$0xff] }
0x1154   :  { %2446 = vpow2.f32 %v1577_v58 }
0x1157   :  { %v1755_v5 = vpop.permute.xlu2 %1754 }
0x115a   :  { %v2447_v62 = vpop.eup %2446 }
0x115b   :  { %v1582_v12 = vsel %vm263_vm10, %v2447_v62, 0.0 }
0x115f   :  { %1615 = vrot.lane.b32.xlu0 %v2990_v16, %s3334_s5 }
0x116d   :  { %v1734_v59 = vpop.xlane.xlu1 %1733 }
0x116e   :  { %v1738_v60 = vsub.f32 %v1730_v49, %v1734_v59 }
0x1170   :  { %v1740_v61 = vmul.f32 1.442695, %v1738_v60 }
0x1172   :  { %2448 = vpow2.f32 %v1740_v61 }
0x1178   :  { %v2449_v63 = vpop.eup %2448 }
0x1179   :  { %v1744_v35 = vsel %vm263_vm10, %v2449_v63, 0.0 }
0x1189   :  { %1583 = vadd.xlane.f32.xlu0 %v1582_v12 }
0x1191   :  { %1745 = vadd.xlane.f32.xlu0 %v1744_v35 }
0x11a5   :  { %1780 = vrot.lane.b32.xlu0 %v2990_v16, %s3337_s1 }
0x11be   :  { %v1737_v20 = vpop.xlane.xlu0 %1736 }
0x11bf   :  { %v1739_v0 = vsub.f32 %v1731_v56, %v1737_v20  ;;  %v2314_v56 = vld [vmem:[%s3255_s13 + $0x30] sm:$0xff]  ;;  %v2366_v20 = vld [vmem:[%s3325_s29 + $0x1] ss:$0 sm:$0xff] }
0x11c1   :  { %v1742_v1 = vmul.f32 1.442695, %v1739_v0  ;;  %v1664_v28 = vpop.f32.mrf.mxu3 }
0x11c2   :  { %v1670_v31 = vadd.f32 %v1664_v28, %v1502_v30  ;;  %v2322_v28 = vld [vmem:[%s3257_s15 + $0x58] sm:$0xff]  ;;  %v2321_v30 = vld [vmem:[%s3257_s15 + $0x50] sm:$0xff] }
0x11c3   :  { %2450 = vpow2.f32 %v1742_v1 }
0x11c9   :  { %v2451_v2 = vpop.eup %2450 }
0x11ca   :  { %v1747_v3 = vsel %vm263_vm10, %v2451_v2, 0.0 }
0x11cb   :  { %1748 = vadd.xlane.f32.xlu1 %v1747_v3 }
0x11d1   :  { %v1616_v4 = vpop.permute.xlu0 %1615 }
0x11d2   :  { %1636 = vmatpush.msra.mxu2 %v1616_v4 }
0x11d4   :  { %1775 = vmatpush.msrb.mxu2 %v1755_v5 }
0x11fc   :  { %v1584_v6 = vpop.xlane.xlu0 %1583 }
0x11fd   :  { %2452 = vrcp.f32 %v1584_v6 }
0x1203   :  { %v2453_v8 = vpop.eup %2452 }
0x1204   :  { %v1588_v9 = vmul.f32 %v2453_v8, %v2447_v62  ;;  %v1746_v11 = vpop.xlane.xlu0 %1745 }
0x1205   :  { %2454 = vrcp.f32 %v1746_v11 }
0x1206   :  { %2299 = vmatmul.msk.f32.vlgmr.msra.gmra.mxu2 %vm263_vm10, %v1588_v9 }
0x120b   :  { %v2455_v16 = vpop.eup %2454 }
0x120c   :  { %v1752_v13 = vmul.f32 %v2455_v16, %v2449_v63 }
0x120e   :  { %2306 = vmatmul.msk.f32.vlgmr.msrb.gmra.mxu2 %vm263_vm10, %v1752_v13 }
0x1217   :  { %v1781_v15 = vpop.permute.xlu0 %1780 }
0x1218   :  { %1801 = vmatpush.msra.mxu0 %v1781_v15 }
0x123e   :  { %v1749_v18 = vpop.xlane.xlu1 %1748 }
0x123f   :  { %2456 = vrcp.f32 %v1749_v18 }
0x1245   :  { %v2457_v19 = vpop.eup %2456 }
0x1246   :  { %v1753_v21 = vmul.f32 %v2457_v19, %v2451_v2  ;;  %v2367_v2 = vld [vmem:[%s3326_s6 + $0x1] ss:$0 sm:$0xff] }
0x1248   :  { %2307 = vmatmul.msk.f32.vlgmr.msra.gmra.mxu0 %vm263_vm10, %v1753_v21 }
0x1289   :  { %v1638_v10 = vpop.f32.mrf.mxu2 }
0x128a   :  { %2301 = vmatmul.msk.f32.gmra.mxu3 %vm263_vm10, %v1638_v10 }
0x1291   :  { %v1777_v14 = vpop.f32.mrf.mxu2 }
0x1292   :  { %2308 = vmatmul.msk.f32.vlgmr.msra.gmra.mxu1 %vm263_vm10, %v1777_v14  ;;  %v2326_v14 = vld [vmem:[%s3257_s15 + $0x78] sm:$0xff] }
0x1293   :  { %1987 = vmatpush.msrb.mxu3 %v2326_v14 }
0x12c5   :  { %v1803_v24 = vpop.f32.mrf.mxu0 }
0x12c6   :  { %2309 = vmatmul.msk.f32.gmra.mxu1 %vm263_vm10, %v1803_v24  ;;  %v2325_v24 = vld [vmem:[%s3257_s15 + $0x70] sm:$0xff] }
0x12c7   :  { %1988 = vmatpush.msrb.mxu3 %v2325_v24 }
0x12c9   :  { %1989 = vmatpush.msrb.mxu3 %v2324_v25 }
0x12cb   :  { %1990 = vmatpush.msrb.mxu3 %v2323_v27 }
0x12cd   :  { %1991 = vmatpush.msrb.mxu3 %v2322_v28 }
0x12cf   :  { %1992 = vmatpush.msrb.mxu3 %v2321_v30 }
0x130d   :  { %v1667_v37 = vpop.f32.mrf.mxu3 }
0x130e   :  { %v1671_v40 = vadd.f32 %v1667_v37, %v1505_v38 }
0x130f   :  { %v1829_v26 = vpop.f32.mrf.mxu1 }
0x1310   :  { %v1835_v17 = vadd.f32 %v1829_v26, %v1670_v31  ;;  %v2320_v31 = vld [vmem:[%s3257_s15 + $0x48] sm:$0xff]  ;;  %v2319_v26 = vld [vmem:[%s3257_s15 + $0x40] sm:$0xff] }
0x1311   :  { %1993 = vmatpush.msrb.mxu3 %v2320_v31 }
0x1312   :  { %v1837_v33 = vadd.f32 %v1835_v17, %v2959_v45  ;;  %v2368_v17 = vld [vmem:[%s3254_s14 + $0x1] ss:$0 sm:$0xff] }
0x1313   :  { %1994 = vmatpush.msrb.mxu3 %v2319_v26 }
0x1314   :  { %v1842_v34 = vadd.f32 %v2365_v32, %v1837_v33 }
0x1316   :  { %v1848_v36 = vsel %vm150_vm2, %v1842_v34, 0.0 }
0x1317   :  { %1849 = vadd.xlane.f32.xlu1 %v1848_v36 }
0x1343   :  { %v1832_v41 = vpop.f32.mrf.mxu1 }
0x1344   :  { %v1836_v42 = vadd.f32 %v1832_v41, %v1671_v40 }
0x1346   :  { %v1838_v22 = vadd.f32 %v1836_v42, %v2984_v7  ;;  %v2315_v7 = vld [vmem:[%s3255_s13 + $0x38] sm:$0xff] }
0x1347   :  { %1930 = vmatpush.msra.mxu2 %v2315_v7 }
0x1348   :  { %v1843_v43 = vadd.f32 %v2365_v32, %v1838_v22 }
0x1349   :  { %1931 = vmatpush.msra.mxu2 %v2314_v56  ;;  %v2369_v56 = vld [vmem:[%s3256_s16 + $0x1] ss:$0 sm:$0xff] }
0x134a   :  { %v1851_v44 = vsel %vm150_vm2, %v1843_v43, 0.0 }
0x134b   :  { %1852 = vadd.xlane.f32.xlu0 %v1851_v44  ;;  %1932 = vmatpush.msra.mxu2 %v2313_v52 }
0x134d   :  { %1933 = vmatpush.msra.mxu2 %v2312_v29 }
0x138a   :  { %v1850_v47 = vpop.xlane.xlu1 %1849 }
0x138b   :  { %v1854_v48 = vmul.f32 %v1850_v47, %v2693_v39 }
0x138d   :  { %v1856_v45 = vsub.f32 %v1842_v34, %v1854_v48 }
0x138f   :  { %v1858_v49 = vmul.f32 %v1856_v45, %v1856_v45 }
0x1391   :  { %v1860_v50 = vsel %vm150_vm2, %v1858_v49, 0.0 }
0x1392   :  { %1861 = vadd.xlane.f32.xlu1 %v1860_v50 }
0x13be   :  { %v1853_v51 = vpop.xlane.xlu0 %1852 }
0x13bf   :  { %v1855_v46 = vmul.f32 %v1853_v51, %v2693_v39 }
0x13c1   :  { %v1857_v53 = vsub.f32 %v1843_v43, %v1855_v46 }
0x13c3   :  { %v1859_v54 = vmul.f32 %v1857_v53, %v1857_v53 }
0x13c5   :  { %v1863_v55 = vsel %vm150_vm2, %v1859_v54, 0.0 }
0x13c6   :  { %1864 = vadd.xlane.f32.xlu2 %v1863_v55 }
0x1405   :  { %v1862_v57 = vpop.xlane.xlu1 %1861 }
0x1406   :  { %v1866_v58 = vmul.f32 %v1862_v57, %v2693_v39 }
0x1408   :  { %v1868_v59 = vadd.f32 1e-12, %v1866_v58 }
0x140a   :  { %2458 = vrsqrt.f32 %v1868_v59  ;;  %vm1876_vm10 = vweird.f32 %v1868_v59 }
0x1410   :  { %v2459_v60 = vpop.eup %2458 }
0x1411   :  { %v1871_v61 = vmul.f32 %v2459_v60, %v1868_v59  ;;  %vm1877_vm9 = vweird.f32 %v2459_v60 }
0x1412   :  { %vm1878_vm11 = vmor %vm1876_vm10, %vm1877_vm9  ;;  %vm2139_vm9 = vcmask 130048  }
0x1413   :  { %v1872_v62 = vmul.f32 %v2459_v60, %v1871_v61 }
0x1415   :  { %v1873_v12 = vmul.f32 0.5, %v1872_v62 }
0x1417   :  { %v1874_v63 = vsub.f32 1.5, %v1873_v12 }
0x1419   :  { %v1875_v35 = vmul.f32 %v2459_v60, %v1874_v63 }
0x141b   :  { %v1879_v0 = vsel %vm1878_vm11, %v2459_v60, %v1875_v35 }
0x141c   :  { %v1890_v1 = vmul.f32 %v1879_v0, %v1856_v45 }
0x141e   :  { %v1895_v3 = vmul.f32 %v2366_v20, %v1890_v1 }
0x1420   :  { %v3129_v4 = vadd.f32 %v2367_v2, %v1895_v3 }
0x1422   :  { %2317 = vmatmul.msk.f32.vlgmr.msra.gmra.mxu2 %vm150_vm2, %v3129_v4 }
0x1439   :  { %v1865_v5 = vpop.xlane.xlu2 %1864 }
0x143a   :  { %v1867_v6 = vmul.f32 %v1865_v5, %v2693_v39 }
0x143c   :  { %v1869_v8 = vadd.f32 1e-12, %v1867_v6 }
0x143e   :  { %2460 = vrsqrt.f32 %v1869_v8  ;;  %vm1886_vm13 = vweird.f32 %v1869_v8 }
0x1444   :  { %v2461_v9 = vpop.eup %2460 }
0x1445   :  { %v1881_v11 = vmul.f32 %v2461_v9, %v1869_v8  ;;  %vm1887_vm12 = vweird.f32 %v2461_v9 }
0x1446   :  { %vm1888_vm15 = vmor %vm1886_vm13, %vm1887_vm12 }
0x1447   :  { %v1882_v16 = vmul.f32 %v2461_v9, %v1881_v11  ;;  %v2063_v11 = vld [vmem:[%s3261_s19 + $0x8] sm:$0xff] }
0x1449   :  { %v1883_v13 = vmul.f32 0.5, %v1882_v16 }
0x144b   :  { %v1884_v15 = vsub.f32 1.5, %v1883_v13  ;;  %v2062_v13 = vld [vmem:[%s3261_s19] sm:$0xff] }
0x144d   :  { %v1885_v18 = vmul.f32 %v2461_v9, %v1884_v15  ;;  %v2099_v15 = vld [vmem:[%s3262_s22] sm:$0x3] }
0x144f   :  { %v1889_v19 = vsel %vm1888_vm15, %v2461_v9, %v1885_v18  ;;  %v2064_v9 = vld [vmem:[%s3261_s19 + $0x10] sm:$0xff] }
0x1450   :  { %v1891_v21 = vmul.f32 %v1889_v19, %v1857_v53 }
0x1452   :  { %v1896_v23 = vmul.f32 %v2366_v20, %v1891_v21 }
0x1454   :  { %v1901_v10 = vadd.f32 %v2367_v2, %v1896_v23 }
0x1456   :  { %2318 = vmatmul.msk.f32.gmra.mxu2 %vm150_vm2, %v1901_v10 }
0x14a5   :  { %v1935_v32 = vpop.f32.mrf.mxu2 }
0x14a6   :  { %v1936_v33 = vadd.f32 %v2368_v17, %v1935_v32 }
0x14a8   :  { %v1943_v34 = vmul.f32 0.044715, %v1936_v33  ;;  %v1941_v42 = vmul.f32 0.5, %v1936_v33 }
0x14aa   :  { %v1945_v36 = vmul.f32 %v1943_v34, %v1936_v33 }
0x14ac   :  { %v1947_v37 = vmul.f32 %v1945_v36, %v1936_v33  ;;  %v2371_v36 = vld [vmem:[%s3259_s18 + $0x1] ss:$0 sm:$0xff] }
0x14ae   :  { %v1949_v38 = vadd.f32 %v1947_v37, %v1936_v33 }
0x14b0   :  { %v1951_v40 = vmul.f32 0.7978846, %v1949_v38 }
0x14b2   :  { %2462 = vtanh.f32 %v1951_v40 }
0x14b8   :  { %v2463_v41 = vpop.eup %2462 }
0x14b9   :  { %v1955_v22 = vadd.f32 1.0, %v2463_v41 }
0x14bb   :  { %v1957_v43 = vmul.f32 %v1955_v22, %v1941_v42 }
0x14bd   :  { %2328 = vmatmul.msk.f32.vlgmr.msrb.gmra.mxu3 %vm1049_vm14, %v1957_v43 }
0x14d9   :  { %v1938_v44 = vpop.f32.mrf.mxu2 }
0x14da   :  { %v1939_v47 = vadd.f32 %v2368_v17, %v1938_v44  ;;  %v2370_v17 = vld [vmem:[%s3258_s17 + $0x1] ss:$0 sm:$0xff] }
0x14dc   :  { %v1944_v48 = vmul.f32 0.044715, %v1939_v47  ;;  %v1942_v53 = vmul.f32 0.5, %v1939_v47 }
0x14de   :  { %v1946_v45 = vmul.f32 %v1944_v48, %v1939_v47  ;;  %v2166_v48 = vld [vmem:[%s3266_s26 + $0x18] sm:$0xff] }
0x14df   :  { %2207 = vmatpush.msra.mxu3 %v2166_v48 }
0x14e0   :  { %v1948_v49 = vmul.f32 %v1946_v45, %v1939_v47  ;;  %v2134_v45 = vld [vmem:[%s3267_s24 + $0x8] sm:$0xff] }
0x14e1   :  { %2157 = vmatpush.msrb.mxu1 %v2134_v45 }
0x14e2   :  { %v1950_v50 = vadd.f32 %v1948_v49, %v1939_v47  ;;  %v2098_v47 = vld [vmem:[%s3264_s21] sm:$0x3]  ;;  %v2165_v49 = vld [vmem:[%s3266_s26 + $0x10] sm:$0xff] }
0x14e3   :  { %2208 = vmatpush.msra.mxu3 %v2165_v49 }
0x14e4   :  { %v1952_v51 = vmul.f32 0.7978846, %v1950_v50  ;;  %v2164_v50 = vld [vmem:[%s3266_s26 + $0x8] sm:$0xff] }
0x14e5   :  { %2209 = vmatpush.msra.mxu3 %v2164_v50 }
0x14e6   :  { %2464 = vtanh.f32 %v1952_v51  ;;  %v2163_v51 = vld [vmem:[%s3266_s26] sm:$0xff] }
0x14e7   :  { %2210 = vmatpush.msra.mxu3 %v2163_v51 }
0x14ec   :  { %v2465_v46 = vpop.eup %2464 }
0x14ed   :  { %v1956_v54 = vadd.f32 1.0, %v2465_v46  ;;  %v2133_v46 = vld [vmem:[%s3267_s24] sm:$0xff] }
0x14ee   :  { %2158 = vmatpush.msrb.mxu1 %v2133_v46 }
0x14ef   :  { %v1958_v55 = vmul.f32 %v1956_v54, %v1942_v53  ;;  %v2168_v53 = vld [vmem:[%s3266_s26 + $0x28] sm:$0xff]  ;;  %v2372_v54 = vld [vmem:[%s3260_s20] ss:$0 sm:$0xff] }
0x14f0   :  { %2186 = vmatpush.msrb.mxu2 %v2168_v53 }
0x14f1   :  { %2329 = vmatmul.msk.f32.gmra.mxu3 %vm1049_vm14, %v1958_v55  ;;  %vm2108_vm14 = vcmask 1041408  }
0x1540   :  { %v1996_v7 = vpop.f32.mrf.mxu3 }
0x1541   :  { %v1997_v58 = vadd.f32 %v2369_v56, %v1996_v7 }
0x1543   :  { %v2002_v60 = vadd.f32 %v1997_v58, %v3129_v4  ;;  %v2065_v4 = vld [vmem:[%s3261_s19 + $0x18] sm:$0xff] }
0x1544   :  { %2089 = vmatpush.msrb.mxu0 %v2065_v4 }
0x1545   :  { %v2008_v61 = vsel %vm150_vm2, %v2002_v60, 0.0 }
0x1546   :  { %2090 = vmatpush.msrb.mxu0 %v2064_v9 }
0x1548   :  { %2091 = vmatpush.msrb.mxu0 %v2063_v11 }
0x154a   :  { %2092 = vmatpush.msrb.mxu0 %v2062_v13 }
0x154c   :  { %2333 = vmatpush.msk.msra.mxu0 %vm2108_vm14, %v2099_v15 }
0x1574   :  { %v1999_v52 = vpop.f32.mrf.mxu3 }
0x1575   :  { %v2000_v29 = vadd.f32 %v2369_v56, %v1999_v52  ;;  %v2373_v56 = vld [vmem:[%s3263_s23] ss:$0 sm:$0xff] }
0x1577   :  { %v2003_v57 = vadd.f32 %v2000_v29, %v1901_v10 }
0x1579   :  { %v2011_v59 = vsel %vm150_vm2, %v2003_v57, 0.0 }
0x157a   :  { %2012 = vadd.xlane.f32.xlu1 %v2011_v59  ;;  %v2167_v59 = vld [vmem:[%s3266_s26 + $0x20] sm:$0xff]  ;;  %s3338_s26 = sld [smem:[#allocation15_spill]] }
0x157b   :  { %2187 = vmatpush.msrb.mxu2 %v2167_v59 }
0x1582   :  { %2009 = vadd.xlane.f32.xlu1 %v2008_v61 }
0x15ed   :  { %v2013_v62 = vpop.xlane.xlu1 %2012 }
0x15ee   :  { %v2015_v12 = vmul.f32 %v2013_v62, %v2693_v39 }
0x15f0   :  { %v2017_v63 = vsub.f32 %v2003_v57, %v2015_v12  ;;  %v2375_v12 = vld [vmem:[%s3268_s27] ss:$0 sm:$0xff] }
0x15f2   :  { %v2019_v35 = vmul.f32 %v2017_v63, %v2017_v63 }
0x15f4   :  { %v2023_v20 = vsel %vm150_vm2, %v2019_v35, 0.0 }
0x15f5   :  { %2024 = vadd.xlane.f32.xlu1 %v2023_v20  ;;  %v2010_v0 = vpop.xlane.xlu1 %2009 }
0x15f6   :  { %v2014_v1 = vmul.f32 %v2010_v0, %v2693_v39 }
0x15f8   :  { %v2016_v2 = vsub.f32 %v2002_v60, %v2014_v1  ;;  %v2374_v60 = vld [vmem:[%s3265_s25] ss:$0 sm:$0xff] }
0x15fa   :  { %v2018_v3 = vmul.f32 %v2016_v2, %v2016_v2 }
0x15fc   :  { %v2020_v5 = vsel %vm150_vm2, %v2018_v3, 0.0 }
0x15fd   :  { %2021 = vadd.xlane.f32.xlu1 %v2020_v5 }
0x1668   :  { %v2025_v6 = vpop.xlane.xlu1 %2024 }
0x1669   :  { %v2027_v8 = vmul.f32 %v2025_v6, %v2693_v39 }
0x166b   :  { %v2029_v16 = vadd.f32 1e-12, %v2027_v8 }
0x166d   :  { %2466 = vrsqrt.f32 %v2029_v16  ;;  %vm2046_vm1 = vweird.f32 %v2029_v16 }
0x1670   :  { %v2022_v18 = vpop.xlane.xlu1 %2021 }
0x1671   :  { %v2026_v19 = vmul.f32 %v2022_v18, %v2693_v39 }
0x1673   :  { %v2467_v21 = vpop.eup %2466  ;;  %v2028_v23 = vadd.f32 1e-12, %v2026_v19 }
0x1674   :  { %v2041_v10 = vmul.f32 %v2467_v21, %v2029_v16  ;;  %vm2047_vm0 = vweird.f32 %v2467_v21 }
0x1675   :  { %2468 = vrsqrt.f32 %v2028_v23  ;;  %vm2048_vm3 = vmor %vm2046_vm1, %vm2047_vm0  ;;  %vm2036_vm5 = vweird.f32 %v2028_v23 }
0x1676   :  { %v2042_v14 = vmul.f32 %v2467_v21, %v2041_v10 }
0x1678   :  { %v2043_v24 = vmul.f32 0.5, %v2042_v14 }
0x167a   :  { %v2044_v25 = vsub.f32 1.5, %v2043_v24 }
0x167b   :  { %v2469_v27 = vpop.eup %2468 }
0x167c   :  { %v2045_v28 = vmul.f32 %v2467_v21, %v2044_v25  ;;  %v2031_v30 = vmul.f32 %v2469_v27, %v2028_v23  ;;  %vm2037_vm4 = vweird.f32 %v2469_v27 }
0x167d   :  { %vm2038_vm6 = vmor %vm2036_vm5, %vm2037_vm4 }
0x167e   :  { %v2049_v31 = vsel %vm2048_vm3, %v2467_v21, %v2045_v28  ;;  %v2032_v26 = vmul.f32 %v2469_v27, %v2031_v30 }
0x167f   :  { %v2051_v39 = vmul.f32 %v2049_v31, %v2017_v63 }
0x1680   :  { %v2033_v32 = vmul.f32 0.5, %v2032_v26 }
0x1681   :  { %v2056_v34 = vmul.f32 %v2370_v17, %v2051_v39 }
0x1682   :  { %v2034_v33 = vsub.f32 1.5, %v2033_v32 }
0x1683   :  { %v2061_v41 = vadd.f32 %v2371_v36, %v2056_v34 }
0x1684   :  { %v2035_v37 = vmul.f32 %v2469_v27, %v2034_v33 }
0x1685   :  { %v2072_v43 = vrot.slane %v2061_v41, 7 }
0x1686   :  { %v2039_v38 = vsel %vm2038_vm6, %v2469_v27, %v2035_v37 }
0x1687   :  { %v2050_v40 = vmul.f32 %v2039_v38, %v2016_v2 }
0x1689   :  { %v2055_v42 = vmul.f32 %v2370_v17, %v2050_v40 }
0x168b   :  { %v2060_v22 = vadd.f32 %v2371_v36, %v2055_v42 }
0x168d   :  { %v2074_v44 = vsel %vm2073_vm7, %v2072_v43, %v2060_v22 }
0x168e   :  { %2332 = vmatmul.msk.f32.vlgmr.msrb.gmra.mxu0 %vm150_vm2, %v2074_v44 }
0x1696   :  { %2334 = vmatmul.msk.f32.vlgmr.msra.gmra.mxu0 %vm2104_vm8, %v2098_v47 }
0x170b   :  { %v2094_v55 = vpop.f32.mrf.mxu0 }
0x170c   :  { %v2095_v7 = vadd.f32 %v2372_v54, %v2094_v55 }
0x170e   :  { %2470 = vtanh.f32 %v2095_v7 }
0x1713   :  { %v2129_v52 = vpop.f32.mrf.mxu0 }
0x1714   :  { %v2471_v29 = vpop.eup %2470  ;;  %v2130_v57 = vadd.f32 %v2373_v56, %v2129_v52 }
0x1715   :  { %2337 = vmatmul.msk.f32.vlgmr.msra.gmra.mxu3 %vm150_vm2, %v2471_v29  ;;  %vm2220_vm2 = vcmask 9216  }
0x1716   :  { %v2132_v58 = vmax.f32 %v2130_v57, 0.0 }
0x1718   :  { %2335 = vmatmul.msk.f32.vlgmr.msrb.gmra.mxu1 %vm2139_vm9, %v2132_v58 }
0x1795   :  { %v2160_v61 = vpop.f32.mrf.mxu1 }
0x1796   :  { %v2161_v62 = vadd.f32 %v2374_v60, %v2160_v61 }
0x1798   :  { %2336 = vmatmul.msk.f32.vlgmr.msrb.gmra.mxu2 %vm2139_vm9, %v2161_v62  ;;  %v2212_v63 = vpop.f32.mrf.mxu3 }
0x181b   :  { %v2189_v35 = vpop.f32.mrf.mxu2 }
0x181c   :  { %v2213_v20 = vadd.f32 %v2212_v63, %v2189_v35 }
0x181e   :  { %v2219_v0 = vadd.f32 %v2375_v12, %v2213_v20 }
0x1820   :  { %2221 = vst.msk [vmem:[%s3338_s26] sm:$0x3] %vm2220_vm2, %v2219_v0 }

</bundles_post_ra>
